<compile_context>
chip_gen: v7x
topology: tpu7x:2x2x1
jax: 0.10.0
libtpu: 0.0.40
codegen_flags: <defaults>
</compile_context>

<pallas_src>
import functools

import jax
import jax.numpy as jnp
from jax.experimental import pallas as pl
from jax.experimental.pallas import tpu as pltpu


def _gaussian_smearing_kernel(dist_ref, offset_ref, out_ref, *, coeff):
    # dist_ref:   (TN, 1)  current tile of distances (column vector)
    # offset_ref: (1, G)   full offset row (resident; same block every step)
    # out_ref:    (TN, G)
    d = dist_ref[...]                      # (TN, 1) f32
    off = offset_ref[...]                  # (1, G)  f32
    diff = d - off                         # broadcast -> (TN, G) on the VPU
    val = jnp.exp(coeff * diff * diff)     # exp on the EUP, f32 math
    out_ref[...] = val.astype(out_ref.dtype)


def _round_up(x, m):
    return ((x + m - 1) // m) * m


def gaussian_smearing(dist, offset, coeff, *, tile_n=2048, out_dtype=jnp.float32):
    """dist: any shape (flattened to N), offset: (G,) -> (N, G) array.

    Note: for tiny N (a few thousand or less) the plain jnp expression is
    already at roofline; the Pallas path targets the production regime
    (N ~ 1e5-1e6 edges).
    """
    dist = jnp.asarray(dist, jnp.float32).reshape(-1)
    n = dist.shape[0]
    g = offset.shape[0]

    # Sublane alignment for the second-to-last block dim: 8 for 4-byte output
    # dtypes, 16 for 2-byte (bf16 packing).
    sub = 8 if jnp.dtype(out_dtype).itemsize >= 4 else 16
    tn = min(_round_up(int(tile_n), sub), _round_up(n, sub))
    grid = (pl.cdiv(n, tn),)

    dist_2d = dist.reshape(n, 1)                              # N on sublanes
    offset_2d = jnp.asarray(offset, jnp.float32).reshape(1, g)  # G on lanes

    kernel = functools.partial(_gaussian_smearing_kernel, coeff=float(coeff))

    return pl.pallas_call(
        kernel,
        out_shape=jax.ShapeDtypeStruct((n, g), out_dtype),
        grid=grid,
        in_specs=[
            pl.BlockSpec((tn, 1), lambda i: (i, 0)),   # dist column tile
            pl.BlockSpec((1, g), lambda i: (0, 0)),    # offset row, resident
        ],
        out_specs=pl.BlockSpec((tn, g), lambda i: (i, 0)),
        compiler_params=pltpu.CompilerParams(
            dimension_semantics=("parallel",),         # shards rows on v7x TCs
        ),
    )(dist_2d, offset_2d)


class GaussianSmearingJAX:
    """Mirror of the PyTorch module's __init__ (deterministic buffers)."""

    def __init__(self, start=0.0, stop=5.0, num_gaussians=50):
        # Note: num_gaussians == 1 divides by zero, same as the PyTorch module.
        self.offset = jnp.linspace(start, stop, num_gaussians, dtype=jnp.float32)
        step = float(self.offset[1] - self.offset[0])
        self.coeff = -0.5 / step ** 2

    def __call__(self, dist, out_dtype=jnp.float32):
        return gaussian_smearing(dist, self.offset, self.coeff, out_dtype=out_dtype)


if __name__ == "__main__":
    key = jax.random.PRNGKey(0)
    # Small example: 1000 pairwise distances in [0, 5), given as a 2-D tensor
    # (the forward flattens, exactly like dist.view(-1, 1) in PyTorch).
    dist = jax.random.uniform(key, (8, 125), dtype=jnp.float32,
                              minval=0.0, maxval=5.0)

    module = GaussianSmearingJAX(start=0.0, stop=5.0, num_gaussians=50)

    # Reference in plain JAX (same math as the PyTorch forward).
    ref = jnp.exp(module.coeff *
                  (dist.reshape(-1)[:, None] - module.offset[None, :]) ** 2)

    # 1) Default path (single big tile here; 2048-row tiles for large N).
    out = module(dist)
    out = jax.block_until_ready(out)
    assert out.shape == (1000, 50)
    assert out.dtype == jnp.float32
    assert jnp.allclose(out, ref, atol=1e-5, rtol=1e-5)

    # 2) Multi-block path with a partial boundary block (no host pad/slice).
    out2 = gaussian_smearing(dist, module.offset, module.coeff, tile_n=256)
    out2 = jax.block_until_ready(out2)
    assert jnp.allclose(out2, ref, atol=1e-5, rtol=1e-5)

    # 3) bf16-store variant (f32 math, narrow writeback).
    out_bf16 = module(dist, out_dtype=jnp.bfloat16)
    out_bf16 = jax.block_until_ready(out_bf16)
    assert out_bf16.dtype == jnp.bfloat16
    assert jnp.allclose(out_bf16.astype(jnp.float32), ref, atol=2e-2, rtol=2e-2)

    print("KERNEL_OK")
</pallas_src>

<mosaic_0001>
module attributes {stable_mosaic.version = 11 : i64} {
  func.func @_gaussian_smearing_kernel(%arg0: i32, %arg1: memref<1000x1xf32, #tpu.memory_space<vmem>>, %arg2: memref<1x50xf32, #tpu.memory_space<vmem>>, %arg3: memref<1000x50xf32, #tpu.memory_space<vmem>>) attributes {dimension_semantics = [#tpu.dimension_semantics<parallel>], iteration_bounds = array<i64: 1>, scalar_prefetch = 0 : i64, scratch_operands = 0 : i64, tpu.core_type = #tpu.core_type<tc>, window_params = [{transform_indices = @transform_0, window_bounds = array<i64: 1000, 1>}, {pipeline_mode = #tpu.pipeline_mode<synchronous>, transform_indices = @transform_1, window_bounds = array<i64: 1, 50>}, {transform_indices = @transform_2, window_bounds = array<i64: 1000, 50>}]} {
    %c0 = arith.constant 0 : index
    %c0_0 = arith.constant 0 : index
    %0 = vector.load %arg1[%c0, %c0_0] : memref<1000x1xf32, #tpu.memory_space<vmem>>, vector<1000x1xf32>
    %c0_1 = arith.constant 0 : index
    %c0_2 = arith.constant 0 : index
    %1 = vector.load %arg2[%c0_1, %c0_2] : memref<1x50xf32, #tpu.memory_space<vmem>>, vector<1x50xf32>
    %2 = vector.broadcast %0 : vector<1000x1xf32> to vector<1000x50xf32>
    %3 = vector.broadcast %1 : vector<1x50xf32> to vector<1000x50xf32>
    %4 = arith.subf %2, %3 : vector<1000x50xf32>
    %cst = arith.constant -48.0200043 : f32
    %5 = vector.broadcast %cst : f32 to vector<1000x50xf32>
    %6 = arith.mulf %5, %4 : vector<1000x50xf32>
    %7 = arith.mulf %6, %4 : vector<1000x50xf32>
    %8 = math.exp %7 : vector<1000x50xf32>
    %c0_3 = arith.constant 0 : index
    %c0_4 = arith.constant 0 : index
    %9 = vector.load %arg3[%c0_3, %c0_4] : memref<1000x50xf32, #tpu.memory_space<vmem>>, vector<1000x50xf32>
    tpu.vector_store %arg3[%c0_3, %c0_4], %8 {strides = array<i32>} : memref<1000x50xf32, #tpu.memory_space<vmem>>, vector<1000x50xf32>,
    return
  }
  func.func @transform_0(%arg0: i32) -> (i32, i32) {
    %c0_i32 = arith.constant 0 : i32
    %c0_i32_0 = arith.constant 0 : i32
    return %arg0, %c0_i32 : i32, i32
  }
  func.func @transform_1(%arg0: i32) -> (i32, i32) {
    %c0_i32 = arith.constant 0 : i32
    %c0_i32_0 = arith.constant 0 : i32
    %c0_i32_1 = arith.constant 0 : i32
    return %c0_i32, %c0_i32_0 : i32, i32
  }
  func.func @transform_2(%arg0: i32) -> (i32, i32) {
    %c0_i32 = arith.constant 0 : i32
    %c0_i32_0 = arith.constant 0 : i32
    return %arg0, %c0_i32 : i32, i32
  }
}

</mosaic_0001>

<bundles_post_ra>
// kernel: tpu_custom_call.1
= control target key start
LH: loop header
LB: loop body
LE: loop exit
PB: predicated region body
PF: predicated region fallthrough
CT: control target
= control target key end

     0   :  { %v1779_v0 = vmov 0   ;;  %vm1393_vm0 = vcmask 408576   ;;  %s2801_s0 = inlined_call_operand.vmem [shape: f32[1000,1], index: 0, kind: input, shape index: {}]   ;;  %s2802_s1 = inlined_call_operand.vmem [shape: f32[1,50], index: 1, kind: input, shape index: {}]   ;;  %s2803_s2 = inlined_call_operand.vmem [shape: f32[1000,50], index: 2, kind: output, shape index: {}]  }
   0x1   :  { %1526 = vset.pattern.permute.xlu1 %v1779_v0  ;;  %1525 = vset.pattern.permute.xlu0 %v1779_v0  ;;  %v13_v1 = vld [vmem:[%s2801_s0 + $0x10] sm:$0xff]  ;;  %v11_v2 = vld [vmem:[%s2801_s0] sm:$0xff]  ;;  %v14_v3 = vld [vmem:[%s2801_s0 + $0x18] sm:$0xff] }
   0x2   :  { %149 = vperm.xlu1 %1526, %v13_v1   ;;  %139 = vperm.xlu0 %1525, %v11_v2   ;;  %v12_v4 = vld [vmem:[%s2801_s0 + $0x8] sm:$0xff]  ;;  %v15_v6 = vld [vmem:[%s2801_s0 + $0x20] sm:$0xff]  ;;  %v18_v7 = vld [vmem:[%s2801_s0 + $0x38] sm:$0xff] }
   0x3   :  { %v16_v5 = vld [vmem:[%s2801_s0 + $0x28] sm:$0xff]  ;;  %v17_v8 = vld [vmem:[%s2801_s0 + $0x30] sm:$0xff]  ;;  %v19_v10 = vld [vmem:[%s2801_s0 + $0x40] sm:$0xff] }
   0x4   :  { %v20_v9 = vld [vmem:[%s2801_s0 + $0x48] sm:$0xff]  ;;  %v22_v11 = vld [vmem:[%s2801_s0 + $0x58] sm:$0xff]  ;;  %v21_v12 = vld [vmem:[%s2801_s0 + $0x50] sm:$0xff] }
   0x5   :  { %v24_v13 = vld [vmem:[%s2801_s0 + $0x68] sm:$0xff]  ;;  %v23_v14 = vld [vmem:[%s2801_s0 + $0x60] sm:$0xff]  ;;  %v26_v15 = vld [vmem:[%s2801_s0 + $0x78] sm:$0xff] }
   0x6   :  { %154 = vperm.xlu1 %1526, %v14_v3   ;;  %144 = vperm.xlu0 %1525, %v12_v4   ;;  %v25_v16 = vld [vmem:[%s2801_s0 + $0x70] sm:$0xff]  ;;  %v28_v17 = vld [vmem:[%s2801_s0 + $0x88] sm:$0xff]  ;;  %v27_v18 = vld [vmem:[%s2801_s0 + $0x80] sm:$0xff] }
   0x7   :  { %v30_v19 = vld [vmem:[%s2801_s0 + $0x98] sm:$0xff]  ;;  %v29_v20 = vld [vmem:[%s2801_s0 + $0x90] sm:$0xff]  ;;  %v32_v21 = vld [vmem:[%s2801_s0 + $0xa8] sm:$0xff] }
   0x8   :  { %v31_v22 = vld [vmem:[%s2801_s0 + $0xa0] sm:$0xff]  ;;  %v34_v23 = vld [vmem:[%s2801_s0 + $0xb8] sm:$0xff]  ;;  %v33_v24 = vld [vmem:[%s2801_s0 + $0xb0] sm:$0xff] }
   0x9   :  { %v36_v25 = vld [vmem:[%s2801_s0 + $0xc8] sm:$0xff]  ;;  %v35_v26 = vld [vmem:[%s2801_s0 + $0xc0] sm:$0xff]  ;;  %v38_v27 = vld [vmem:[%s2801_s0 + $0xd8] sm:$0xff] }
   0xa   :  { %164 = vperm.xlu1 %1526, %v16_v5   ;;  %159 = vperm.xlu0 %1525, %v15_v6   ;;  %v37_v28 = vld [vmem:[%s2801_s0 + $0xd0] sm:$0xff]  ;;  %v40_v29 = vld [vmem:[%s2801_s0 + $0xe8] sm:$0xff]  ;;  %v39_v30 = vld [vmem:[%s2801_s0 + $0xe0] sm:$0xff] }
   0xb   :  { %v42_v31 = vld [vmem:[%s2801_s0 + $0xf8] sm:$0xff]  ;;  %v41_v32 = vld [vmem:[%s2801_s0 + $0xf0] sm:$0xff]  ;;  %v44_v33 = vld [vmem:[%s2801_s0 + $0x108] sm:$0xff] }
   0xc   :  { %v43_v34 = vld [vmem:[%s2801_s0 + $0x100] sm:$0xff]  ;;  %v46_v35 = vld [vmem:[%s2801_s0 + $0x118] sm:$0xff]  ;;  %v45_v36 = vld [vmem:[%s2801_s0 + $0x110] sm:$0xff] }
   0xd   :  { %v48_v37 = vld [vmem:[%s2801_s0 + $0x128] sm:$0xff]  ;;  %v47_v38 = vld [vmem:[%s2801_s0 + $0x120] sm:$0xff]  ;;  %v50_v39 = vld [vmem:[%s2801_s0 + $0x138] sm:$0xff] }
   0xe   :  { %174 = vperm.xlu1 %1526, %v18_v7   ;;  %169 = vperm.xlu0 %1525, %v17_v8   ;;  %v49_v40 = vld [vmem:[%s2801_s0 + $0x130] sm:$0xff]  ;;  %v52_v41 = vld [vmem:[%s2801_s0 + $0x148] sm:$0xff]  ;;  %v51_v42 = vld [vmem:[%s2801_s0 + $0x140] sm:$0xff] }
   0xf   :  { %v54_v43 = vld [vmem:[%s2801_s0 + $0x158] sm:$0xff]  ;;  %v53_v44 = vld [vmem:[%s2801_s0 + $0x150] sm:$0xff]  ;;  %v56_v45 = vld [vmem:[%s2801_s0 + $0x168] sm:$0xff] }
  0x10   :  { %v55_v46 = vld [vmem:[%s2801_s0 + $0x160] sm:$0xff]  ;;  %v58_v47 = vld [vmem:[%s2801_s0 + $0x178] sm:$0xff]  ;;  %v57_v48 = vld [vmem:[%s2801_s0 + $0x170] sm:$0xff] }
  0x11   :  { %v60_v49 = vld [vmem:[%s2801_s0 + $0x188] sm:$0xff]  ;;  %v59_v50 = vld [vmem:[%s2801_s0 + $0x180] sm:$0xff]  ;;  %v62_v51 = vld [vmem:[%s2801_s0 + $0x198] sm:$0xff] }
  0x12   :  { %184 = vperm.xlu1 %1526, %v20_v9   ;;  %179 = vperm.xlu0 %1525, %v19_v10   ;;  %v61_v52 = vld [vmem:[%s2801_s0 + $0x190] sm:$0xff]  ;;  %v64_v53 = vld [vmem:[%s2801_s0 + $0x1a8] sm:$0xff]  ;;  %v63_v54 = vld [vmem:[%s2801_s0 + $0x1a0] sm:$0xff] }
  0x13   :  { %v66_v55 = vld [vmem:[%s2801_s0 + $0x1b8] sm:$0xff]  ;;  %v65_v56 = vld [vmem:[%s2801_s0 + $0x1b0] sm:$0xff]  ;;  %v68_v57 = vld [vmem:[%s2801_s0 + $0x1c8] sm:$0xff] }
  0x14   :  { %v67_v58 = vld [vmem:[%s2801_s0 + $0x1c0] sm:$0xff]  ;;  %v70_v59 = vld [vmem:[%s2801_s0 + $0x1d8] sm:$0xff]  ;;  %v69_v60 = vld [vmem:[%s2801_s0 + $0x1d0] sm:$0xff] }
  0x15   :  { %v72_v61 = vld [vmem:[%s2801_s0 + $0x1e8] sm:$0xff]  ;;  %v71_v62 = vld [vmem:[%s2801_s0 + $0x1e0] sm:$0xff]  ;;  %v74_v63 = vld [vmem:[%s2801_s0 + $0x1f8] sm:$0xff] }
  0x16   :  { %194 = vperm.xlu1 %1526, %v22_v11   ;;  %189 = vperm.xlu0 %1525, %v21_v12   ;;  %v73_v0 = vld [vmem:[%s2801_s0 + $0x1f0] sm:$0xff]  ;;  %v1990_v1 = vld [vmem:[%s2802_s1] ss:$0 sm:$0xff]  ;;  %v76_v2 = vld [vmem:[%s2801_s0 + $0x208] sm:$0xff] }
  0x17   :  { %v75_v3 = vld [vmem:[%s2801_s0 + $0x200] sm:$0xff]  ;;  %v78_v8 = vld [vmem:[%s2801_s0 + $0x218] sm:$0xff]  ;;  %v77_v11 = vld [vmem:[%s2801_s0 + $0x210] sm:$0xff] }
  0x1a   :  { %204 = vperm.xlu1 %1526, %v24_v13   ;;  %199 = vperm.xlu0 %1525, %v23_v14  }
  0x1e   :  { %214 = vperm.xlu1 %1526, %v26_v15   ;;  %209 = vperm.xlu0 %1525, %v25_v16  }
  0x22   :  { %224 = vperm.xlu1 %1526, %v28_v17   ;;  %219 = vperm.xlu0 %1525, %v27_v18   ;;  %v80_v18 = vld [vmem:[%s2801_s0 + $0x228] sm:$0xff] }
  0x26   :  { %234 = vperm.xlu1 %1526, %v30_v19   ;;  %229 = vperm.xlu0 %1525, %v29_v20   ;;  %v79_v19 = vld [vmem:[%s2801_s0 + $0x220] sm:$0xff] }
  0x2a   :  { %244 = vperm.xlu1 %1526, %v32_v21   ;;  %239 = vperm.xlu0 %1525, %v31_v22  }
  0x2e   :  { %254 = vperm.xlu1 %1526, %v34_v23   ;;  %249 = vperm.xlu0 %1525, %v33_v24  }
  0x32   :  { %264 = vperm.xlu1 %1526, %v36_v25   ;;  %259 = vperm.xlu0 %1525, %v35_v26  }
  0x36   :  { %274 = vperm.xlu1 %1526, %v38_v27   ;;  %269 = vperm.xlu0 %1525, %v37_v28  }
  0x3a   :  { %284 = vperm.xlu1 %1526, %v40_v29   ;;  %279 = vperm.xlu0 %1525, %v39_v30   ;;  %v82_v30 = vld [vmem:[%s2801_s0 + $0x238] sm:$0xff] }
  0x3e   :  { %294 = vperm.xlu1 %1526, %v42_v31   ;;  %289 = vperm.xlu0 %1525, %v41_v32   ;;  %v81_v31 = vld [vmem:[%s2801_s0 + $0x230] sm:$0xff] }
  0x42   :  { %304 = vperm.xlu1 %1526, %v44_v33   ;;  %299 = vperm.xlu0 %1525, %v43_v34  }
  0x46   :  { %314 = vperm.xlu1 %1526, %v46_v35   ;;  %309 = vperm.xlu0 %1525, %v45_v36  }
  0x4a   :  { %324 = vperm.xlu1 %1526, %v48_v37   ;;  %319 = vperm.xlu0 %1525, %v47_v38  }
  0x4e   :  { %334 = vperm.xlu1 %1526, %v50_v39   ;;  %329 = vperm.xlu0 %1525, %v49_v40  }
  0x52   :  { %344 = vperm.xlu1 %1526, %v52_v41   ;;  %339 = vperm.xlu0 %1525, %v51_v42   ;;  %v84_v42 = vld [vmem:[%s2801_s0 + $0x248] sm:$0xff] }
  0x56   :  { %354 = vperm.xlu1 %1526, %v54_v43   ;;  %349 = vperm.xlu0 %1525, %v53_v44   ;;  %v83_v43 = vld [vmem:[%s2801_s0 + $0x240] sm:$0xff] }
  0x5a   :  { %364 = vperm.xlu1 %1526, %v56_v45   ;;  %359 = vperm.xlu0 %1525, %v55_v46  }
  0x5e   :  { %374 = vperm.xlu1 %1526, %v58_v47   ;;  %369 = vperm.xlu0 %1525, %v57_v48  }
  0x62   :  { %384 = vperm.xlu1 %1526, %v60_v49   ;;  %379 = vperm.xlu0 %1525, %v59_v50  }
  0x66   :  { %394 = vperm.xlu1 %1526, %v62_v51   ;;  %389 = vperm.xlu0 %1525, %v61_v52  }
  0x6a   :  { %404 = vperm.xlu1 %1526, %v64_v53   ;;  %399 = vperm.xlu0 %1525, %v63_v54   ;;  %v86_v54 = vld [vmem:[%s2801_s0 + $0x258] sm:$0xff] }
  0x6e   :  { %414 = vperm.xlu1 %1526, %v66_v55   ;;  %409 = vperm.xlu0 %1525, %v65_v56   ;;  %v85_v55 = vld [vmem:[%s2801_s0 + $0x250] sm:$0xff] }
  0x72   :  { %424 = vperm.xlu1 %1526, %v68_v57   ;;  %419 = vperm.xlu0 %1525, %v67_v58  }
  0x76   :  { %434 = vperm.xlu1 %1526, %v70_v59   ;;  %429 = vperm.xlu0 %1525, %v69_v60  }
  0x7a   :  { %444 = vperm.xlu1 %1526, %v72_v61   ;;  %439 = vperm.xlu0 %1525, %v71_v62  }
  0x7e   :  { %454 = vperm.xlu1 %1526, %v74_v63   ;;  %449 = vperm.xlu0 %1525, %v73_v0  }
  0x81   :  { %v150_v4 = vpop.permute.xlu1 %149  ;;  %v140_v5 = vpop.permute.xlu0 %139 }
  0x82   :  { %v770_v6 = vsub.f32 %v150_v4, %v1990_v1  ;;  %v768_v7 = vsub.f32 %v140_v5, %v1990_v1  ;;  %464 = vperm.xlu1 %1526, %v76_v2   ;;  %459 = vperm.xlu0 %1525, %v75_v3   ;;  %v88_v5 = vld [vmem:[%s2801_s0 + $0x268] sm:$0xff] }
  0x84   :  { %v895_v9 = vmul.f32 -48.020004, %v770_v6  ;;  %v893_v10 = vmul.f32 -48.020004, %v768_v7 }
  0x85   :  { %v155_v12 = vpop.permute.xlu1 %154  ;;  %v145_v13 = vpop.permute.xlu0 %144 }
  0x86   :  { %v1020_v14 = vmul.f32 %v895_v9, %v770_v6  ;;  %v1018_v15 = vmul.f32 %v893_v10, %v768_v7  ;;  %v771_v16 = vsub.f32 %v155_v12, %v1990_v1  ;;  %v769_v17 = vsub.f32 %v145_v13, %v1990_v1  ;;  %474 = vperm.xlu1 %1526, %v78_v8   ;;  %v87_v6 = vld [vmem:[%s2801_s0 + $0x260] sm:$0xff] }
  0x87   :  { %469 = vperm.xlu0 %1525, %v77_v11  }
  0x88   :  { %v1147_v20 = vmul.f32 1.442695, %v1020_v14  ;;  %v1143_v21 = vmul.f32 1.442695, %v1018_v15  ;;  %v896_v22 = vmul.f32 -48.020004, %v771_v16 }
  0x89   :  { %v894_v23 = vmul.f32 -48.020004, %v769_v17  ;;  %v165_v24 = vpop.permute.xlu1 %164  ;;  %v160_v25 = vpop.permute.xlu0 %159 }
  0x8a   :  { %1527 = vpow2.f32 %v1147_v20  ;;  %v1021_v26 = vmul.f32 %v896_v22, %v771_v16  ;;  %v773_v27 = vsub.f32 %v165_v24, %v1990_v1  ;;  %v772_v28 = vsub.f32 %v160_v25, %v1990_v1  ;;  %484 = vperm.xlu1 %1526, %v80_v18   ;;  %v89_v20 = vld [vmem:[%s2801_s0 + $0x270] sm:$0xff] }
  0x8b   :  { %1529 = vpow2.f32 %v1143_v21  ;;  %v1019_v29 = vmul.f32 %v894_v23, %v769_v17  ;;  %479 = vperm.xlu0 %1525, %v79_v19   ;;  %v90_v19 = vld [vmem:[%s2801_s0 + $0x278] sm:$0xff] }
  0x8c   :  { %v1149_v32 = vmul.f32 1.442695, %v1021_v26  ;;  %v898_v33 = vmul.f32 -48.020004, %v773_v27  ;;  %v897_v34 = vmul.f32 -48.020004, %v772_v28 }
  0x8d   :  { %v1145_v35 = vmul.f32 1.442695, %v1019_v29  ;;  %v175_v36 = vpop.permute.xlu1 %174  ;;  %v170_v37 = vpop.permute.xlu0 %169 }
  0x8e   :  { %1531 = vpow2.f32 %v1149_v32  ;;  %v1023_v38 = vmul.f32 %v898_v33, %v773_v27  ;;  %v1022_v39 = vmul.f32 %v897_v34, %v772_v28  ;;  %v775_v40 = vsub.f32 %v175_v36, %v1990_v1  ;;  %494 = vperm.xlu1 %1526, %v82_v30   ;;  %v92_v33 = vld [vmem:[%s2801_s0 + $0x288] sm:$0xff]  ;;  %v91_v34 = vld [vmem:[%s2801_s0 + $0x280] sm:$0xff] }
  0x8f   :  { %1533 = vpow2.f32 %v1145_v35  ;;  %v774_v41 = vsub.f32 %v170_v37, %v1990_v1  ;;  %489 = vperm.xlu0 %1525, %v81_v31  }
  0x90   :  { %v1153_v44 = vmul.f32 1.442695, %v1023_v38  ;;  %v1151_v45 = vmul.f32 1.442695, %v1022_v39  ;;  %v900_v46 = vmul.f32 -48.020004, %v775_v40 }
  0x91   :  { %v899_v47 = vmul.f32 -48.020004, %v774_v41  ;;  %v185_v48 = vpop.permute.xlu1 %184  ;;  %v180_v49 = vpop.permute.xlu0 %179 }
  0x92   :  { %1535 = vpow2.f32 %v1153_v44  ;;  %v1025_v50 = vmul.f32 %v900_v46, %v775_v40  ;;  %v777_v51 = vsub.f32 %v185_v48, %v1990_v1  ;;  %v776_v52 = vsub.f32 %v180_v49, %v1990_v1  ;;  %504 = vperm.xlu1 %1526, %v84_v42   ;;  %v93_v48 = vld [vmem:[%s2801_s0 + $0x290] sm:$0xff] }
  0x93   :  { %1537 = vpow2.f32 %v1151_v45  ;;  %v1024_v53 = vmul.f32 %v899_v47, %v774_v41  ;;  %499 = vperm.xlu0 %1525, %v83_v43   ;;  %v94_v47 = vld [vmem:[%s2801_s0 + $0x298] sm:$0xff] }
  0x94   :  { %v1528_v56 = vpop.eup %1527  ;;  %v1157_v57 = vmul.f32 1.442695, %v1025_v50  ;;  %v902_v58 = vmul.f32 -48.020004, %v777_v51  ;;  %v901_v59 = vmul.f32 -48.020004, %v776_v52 }
  0x95   :  { %v1530_v60 = vpop.eup %1529  ;;  %1396 = vst.msk [vmem:[%s2803_s2 + $0x10] sm:$0xff] %vm1393_vm0, %v1528_v56  ;;  %v1155_v61 = vmul.f32 1.442695, %v1024_v53  ;;  %v195_v62 = vpop.permute.xlu1 %194 }
  0x96   :  { %v190_v63 = vpop.permute.xlu0 %189  ;;  %1394 = vst.msk [vmem:[%s2803_s2] sm:$0xff] %vm1393_vm0, %v1530_v60  ;;  %1539 = vpow2.f32 %v1157_v57  ;;  %v1027_v0 = vmul.f32 %v902_v58, %v777_v51  ;;  %v1026_v2 = vmul.f32 %v901_v59, %v776_v52  ;;  %v779_v3 = vsub.f32 %v195_v62, %v1990_v1  ;;  %514 = vperm.xlu1 %1526, %v86_v54   ;;  %v95_v62 = vld [vmem:[%s2801_s0 + $0x2a0] sm:$0xff] }
  0x97   :  { %1541 = vpow2.f32 %v1155_v61  ;;  %v778_v4 = vsub.f32 %v190_v63, %v1990_v1  ;;  %509 = vperm.xlu0 %1525, %v85_v55   ;;  %v96_v61 = vld [vmem:[%s2801_s0 + $0x2a8] sm:$0xff] }
  0x98   :  { %v1532_v7 = vpop.eup %1531  ;;  %v1161_v8 = vmul.f32 1.442695, %v1027_v0  ;;  %v1159_v9 = vmul.f32 1.442695, %v1026_v2  ;;  %v904_v10 = vmul.f32 -48.020004, %v779_v3 }
  0x99   :  { %v1534_v11 = vpop.eup %1533  ;;  %1397 = vst.msk [vmem:[%s2803_s2 + $0x18] sm:$0xff] %vm1393_vm0, %v1532_v7  ;;  %v903_v12 = vmul.f32 -48.020004, %v778_v4  ;;  %v205_v13 = vpop.permute.xlu1 %204 }
  0x9a   :  { %v200_v14 = vpop.permute.xlu0 %199  ;;  %1395 = vst.msk [vmem:[%s2803_s2 + $0x8] sm:$0xff] %vm1393_vm0, %v1534_v11  ;;  %1543 = vpow2.f32 %v1161_v8  ;;  %v1029_v15 = vmul.f32 %v904_v10, %v779_v3  ;;  %v781_v16 = vsub.f32 %v205_v13, %v1990_v1  ;;  %524 = vperm.xlu1 %1526, %v88_v5   ;;  %v97_v13 = vld [vmem:[%s2801_s0 + $0x2b0] sm:$0xff] }
  0x9b   :  { %v780_v17 = vsub.f32 %v200_v14, %v1990_v1  ;;  %1545 = vpow2.f32 %v1159_v9  ;;  %v1028_v18 = vmul.f32 %v903_v12, %v778_v4  ;;  %519 = vperm.xlu0 %1525, %v87_v6   ;;  %v98_v12 = vld [vmem:[%s2801_s0 + $0x2b8] sm:$0xff] }
  0x9c   :  { %v1536_v21 = vpop.eup %1535  ;;  %v1165_v22 = vmul.f32 1.442695, %v1029_v15  ;;  %v906_v23 = vmul.f32 -48.020004, %v781_v16 }
  0x9d   :  { %v905_v24 = vmul.f32 -48.020004, %v780_v17  ;;  %v1538_v25 = vpop.eup %1537  ;;  %1399 = vst.msk [vmem:[%s2803_s2 + $0x28] sm:$0xff] %vm1393_vm0, %v1536_v21  ;;  %v1163_v26 = vmul.f32 1.442695, %v1028_v18  ;;  %v215_v27 = vpop.permute.xlu1 %214 }
  0x9e   :  { %v210_v28 = vpop.permute.xlu0 %209  ;;  %1398 = vst.msk [vmem:[%s2803_s2 + $0x20] sm:$0xff] %vm1393_vm0, %v1538_v25  ;;  %1547 = vpow2.f32 %v1165_v22  ;;  %v1031_v29 = vmul.f32 %v906_v23, %v781_v16  ;;  %v783_v31 = vsub.f32 %v215_v27, %v1990_v1  ;;  %534 = vperm.xlu1 %1526, %v90_v19   ;;  %v99_v27 = vld [vmem:[%s2801_s0 + $0x2c0] sm:$0xff] }
  0x9f   :  { %v1030_v30 = vmul.f32 %v905_v24, %v780_v17  ;;  %1549 = vpow2.f32 %v1163_v26  ;;  %v782_v32 = vsub.f32 %v210_v28, %v1990_v1  ;;  %529 = vperm.xlu0 %1525, %v89_v20   ;;  %v100_v26 = vld [vmem:[%s2801_s0 + $0x2c8] sm:$0xff] }
  0xa0   :  { %v1540_v35 = vpop.eup %1539  ;;  %v1169_v36 = vmul.f32 1.442695, %v1031_v29  ;;  %v908_v38 = vmul.f32 -48.020004, %v783_v31 }
  0xa1   :  { %v1167_v37 = vmul.f32 1.442695, %v1030_v30  ;;  %v1542_v39 = vpop.eup %1541  ;;  %1401 = vst.msk [vmem:[%s2803_s2 + $0x38] sm:$0xff] %vm1393_vm0, %v1540_v35  ;;  %v907_v40 = vmul.f32 -48.020004, %v782_v32  ;;  %v225_v41 = vpop.permute.xlu1 %224 }
  0xa2   :  { %v220_v42 = vpop.permute.xlu0 %219  ;;  %1400 = vst.msk [vmem:[%s2803_s2 + $0x30] sm:$0xff] %vm1393_vm0, %v1542_v39  ;;  %1551 = vpow2.f32 %v1169_v36  ;;  %v1033_v43 = vmul.f32 %v908_v38, %v783_v31  ;;  %v785_v44 = vsub.f32 %v225_v41, %v1990_v1  ;;  %544 = vperm.xlu1 %1526, %v92_v33   ;;  %v101_v41 = vld [vmem:[%s2801_s0 + $0x2d0] sm:$0xff] }
  0xa3   :  { %v784_v45 = vsub.f32 %v220_v42, %v1990_v1  ;;  %1553 = vpow2.f32 %v1167_v37  ;;  %v1032_v46 = vmul.f32 %v907_v40, %v782_v32  ;;  %539 = vperm.xlu0 %1525, %v91_v34   ;;  %v102_v40 = vld [vmem:[%s2801_s0 + $0x2d8] sm:$0xff] }
  0xa4   :  { %v1544_v49 = vpop.eup %1543  ;;  %v1173_v50 = vmul.f32 1.442695, %v1033_v43  ;;  %v910_v51 = vmul.f32 -48.020004, %v785_v44 }
  0xa5   :  { %v909_v52 = vmul.f32 -48.020004, %v784_v45  ;;  %v1546_v53 = vpop.eup %1545  ;;  %1403 = vst.msk [vmem:[%s2803_s2 + $0x48] sm:$0xff] %vm1393_vm0, %v1544_v49  ;;  %v1171_v54 = vmul.f32 1.442695, %v1032_v46  ;;  %v235_v55 = vpop.permute.xlu1 %234 }
  0xa6   :  { %v230_v56 = vpop.permute.xlu0 %229  ;;  %1402 = vst.msk [vmem:[%s2803_s2 + $0x40] sm:$0xff] %vm1393_vm0, %v1546_v53  ;;  %1555 = vpow2.f32 %v1173_v50  ;;  %v1035_v57 = vmul.f32 %v910_v51, %v785_v44  ;;  %v787_v59 = vsub.f32 %v235_v55, %v1990_v1  ;;  %554 = vperm.xlu1 %1526, %v94_v47   ;;  %v103_v55 = vld [vmem:[%s2801_s0 + $0x2e0] sm:$0xff] }
  0xa7   :  { %v1034_v58 = vmul.f32 %v909_v52, %v784_v45  ;;  %1557 = vpow2.f32 %v1171_v54  ;;  %v786_v60 = vsub.f32 %v230_v56, %v1990_v1  ;;  %549 = vperm.xlu0 %1525, %v93_v48   ;;  %v104_v54 = vld [vmem:[%s2801_s0 + $0x2e8] sm:$0xff] }
  0xa8   :  { %v1548_v63 = vpop.eup %1547  ;;  %v1177_v0 = vmul.f32 1.442695, %v1035_v57  ;;  %v912_v3 = vmul.f32 -48.020004, %v787_v59 }
  0xa9   :  { %v1175_v2 = vmul.f32 1.442695, %v1034_v58  ;;  %v1550_v4 = vpop.eup %1549  ;;  %1405 = vst.msk [vmem:[%s2803_s2 + $0x58] sm:$0xff] %vm1393_vm0, %v1548_v63  ;;  %v911_v5 = vmul.f32 -48.020004, %v786_v60  ;;  %v245_v6 = vpop.permute.xlu1 %244 }
  0xaa   :  { %v240_v7 = vpop.permute.xlu0 %239  ;;  %1404 = vst.msk [vmem:[%s2803_s2 + $0x50] sm:$0xff] %vm1393_vm0, %v1550_v4  ;;  %1559 = vpow2.f32 %v1177_v0  ;;  %v1037_v8 = vmul.f32 %v912_v3, %v787_v59  ;;  %v789_v9 = vsub.f32 %v245_v6, %v1990_v1  ;;  %564 = vperm.xlu1 %1526, %v96_v61   ;;  %v105_v6 = vld [vmem:[%s2801_s0 + $0x2f0] sm:$0xff] }
  0xab   :  { %v788_v10 = vsub.f32 %v240_v7, %v1990_v1  ;;  %1561 = vpow2.f32 %v1175_v2  ;;  %v1036_v11 = vmul.f32 %v911_v5, %v786_v60  ;;  %559 = vperm.xlu0 %1525, %v95_v62   ;;  %v106_v5 = vld [vmem:[%s2801_s0 + $0x2f8] sm:$0xff] }
  0xac   :  { %v1552_v14 = vpop.eup %1551  ;;  %v1181_v15 = vmul.f32 1.442695, %v1037_v8  ;;  %v914_v16 = vmul.f32 -48.020004, %v789_v9 }
  0xad   :  { %v913_v17 = vmul.f32 -48.020004, %v788_v10  ;;  %v1554_v18 = vpop.eup %1553  ;;  %1407 = vst.msk [vmem:[%s2803_s2 + $0x68] sm:$0xff] %vm1393_vm0, %v1552_v14  ;;  %v1179_v19 = vmul.f32 1.442695, %v1036_v11  ;;  %v255_v20 = vpop.permute.xlu1 %254 }
  0xae   :  { %v250_v21 = vpop.permute.xlu0 %249  ;;  %1406 = vst.msk [vmem:[%s2803_s2 + $0x60] sm:$0xff] %vm1393_vm0, %v1554_v18  ;;  %1563 = vpow2.f32 %v1181_v15  ;;  %v1039_v22 = vmul.f32 %v914_v16, %v789_v9  ;;  %v791_v24 = vsub.f32 %v255_v20, %v1990_v1  ;;  %574 = vperm.xlu1 %1526, %v98_v12   ;;  %v107_v20 = vld [vmem:[%s2801_s0 + $0x300] sm:$0xff] }
  0xaf   :  { %v1038_v23 = vmul.f32 %v913_v17, %v788_v10  ;;  %1565 = vpow2.f32 %v1179_v19  ;;  %v790_v25 = vsub.f32 %v250_v21, %v1990_v1  ;;  %569 = vperm.xlu0 %1525, %v97_v13   ;;  %v108_v19 = vld [vmem:[%s2801_s0 + $0x308] sm:$0xff] }
  0xb0   :  { %v1556_v28 = vpop.eup %1555  ;;  %v1185_v29 = vmul.f32 1.442695, %v1039_v22  ;;  %v916_v31 = vmul.f32 -48.020004, %v791_v24 }
  0xb1   :  { %v1183_v30 = vmul.f32 1.442695, %v1038_v23  ;;  %v1558_v32 = vpop.eup %1557  ;;  %1409 = vst.msk [vmem:[%s2803_s2 + $0x78] sm:$0xff] %vm1393_vm0, %v1556_v28  ;;  %v915_v33 = vmul.f32 -48.020004, %v790_v25  ;;  %v265_v34 = vpop.permute.xlu1 %264 }
  0xb2   :  { %v260_v35 = vpop.permute.xlu0 %259  ;;  %1408 = vst.msk [vmem:[%s2803_s2 + $0x70] sm:$0xff] %vm1393_vm0, %v1558_v32  ;;  %1567 = vpow2.f32 %v1185_v29  ;;  %v1041_v36 = vmul.f32 %v916_v31, %v791_v24  ;;  %v793_v37 = vsub.f32 %v265_v34, %v1990_v1  ;;  %584 = vperm.xlu1 %1526, %v100_v26   ;;  %v109_v34 = vld [vmem:[%s2801_s0 + $0x310] sm:$0xff] }
  0xb3   :  { %v792_v38 = vsub.f32 %v260_v35, %v1990_v1  ;;  %1569 = vpow2.f32 %v1183_v30  ;;  %v1040_v39 = vmul.f32 %v915_v33, %v790_v25  ;;  %579 = vperm.xlu0 %1525, %v99_v27   ;;  %v110_v33 = vld [vmem:[%s2801_s0 + $0x318] sm:$0xff] }
  0xb4   :  { %v1560_v42 = vpop.eup %1559  ;;  %v1189_v43 = vmul.f32 1.442695, %v1041_v36  ;;  %v918_v44 = vmul.f32 -48.020004, %v793_v37 }
  0xb5   :  { %v917_v45 = vmul.f32 -48.020004, %v792_v38  ;;  %v1562_v46 = vpop.eup %1561  ;;  %1411 = vst.msk [vmem:[%s2803_s2 + $0x88] sm:$0xff] %vm1393_vm0, %v1560_v42  ;;  %v1187_v47 = vmul.f32 1.442695, %v1040_v39  ;;  %v275_v48 = vpop.permute.xlu1 %274 }
  0xb6   :  { %v270_v49 = vpop.permute.xlu0 %269  ;;  %1410 = vst.msk [vmem:[%s2803_s2 + $0x80] sm:$0xff] %vm1393_vm0, %v1562_v46  ;;  %1571 = vpow2.f32 %v1189_v43  ;;  %v1043_v50 = vmul.f32 %v918_v44, %v793_v37  ;;  %v795_v52 = vsub.f32 %v275_v48, %v1990_v1  ;;  %594 = vperm.xlu1 %1526, %v102_v40   ;;  %v111_v48 = vld [vmem:[%s2801_s0 + $0x320] sm:$0xff] }
  0xb7   :  { %v1042_v51 = vmul.f32 %v917_v45, %v792_v38  ;;  %1573 = vpow2.f32 %v1187_v47  ;;  %v794_v53 = vsub.f32 %v270_v49, %v1990_v1  ;;  %589 = vperm.xlu0 %1525, %v101_v41   ;;  %v112_v47 = vld [vmem:[%s2801_s0 + $0x328] sm:$0xff] }
  0xb8   :  { %v1564_v56 = vpop.eup %1563  ;;  %v1193_v57 = vmul.f32 1.442695, %v1043_v50  ;;  %v920_v59 = vmul.f32 -48.020004, %v795_v52 }
  0xb9   :  { %v1191_v58 = vmul.f32 1.442695, %v1042_v51  ;;  %v1566_v60 = vpop.eup %1565  ;;  %1413 = vst.msk [vmem:[%s2803_s2 + $0x98] sm:$0xff] %vm1393_vm0, %v1564_v56  ;;  %v919_v61 = vmul.f32 -48.020004, %v794_v53  ;;  %v285_v62 = vpop.permute.xlu1 %284 }
  0xba   :  { %v280_v63 = vpop.permute.xlu0 %279  ;;  %1412 = vst.msk [vmem:[%s2803_s2 + $0x90] sm:$0xff] %vm1393_vm0, %v1566_v60  ;;  %1575 = vpow2.f32 %v1193_v57  ;;  %v1045_v0 = vmul.f32 %v920_v59, %v795_v52  ;;  %v797_v2 = vsub.f32 %v285_v62, %v1990_v1  ;;  %604 = vperm.xlu1 %1526, %v104_v54   ;;  %v113_v62 = vld [vmem:[%s2801_s0 + $0x330] sm:$0xff] }
  0xbb   :  { %v796_v3 = vsub.f32 %v280_v63, %v1990_v1  ;;  %1577 = vpow2.f32 %v1191_v58  ;;  %v1044_v4 = vmul.f32 %v919_v61, %v794_v53  ;;  %599 = vperm.xlu0 %1525, %v103_v55   ;;  %v114_v61 = vld [vmem:[%s2801_s0 + $0x338] sm:$0xff] }
  0xbc   :  { %v1568_v7 = vpop.eup %1567  ;;  %v1197_v8 = vmul.f32 1.442695, %v1045_v0  ;;  %v922_v9 = vmul.f32 -48.020004, %v797_v2 }
  0xbd   :  { %v921_v10 = vmul.f32 -48.020004, %v796_v3  ;;  %v1570_v11 = vpop.eup %1569  ;;  %1415 = vst.msk [vmem:[%s2803_s2 + $0xa8] sm:$0xff] %vm1393_vm0, %v1568_v7  ;;  %v1195_v12 = vmul.f32 1.442695, %v1044_v4  ;;  %v295_v13 = vpop.permute.xlu1 %294 }
  0xbe   :  { %v290_v14 = vpop.permute.xlu0 %289  ;;  %1414 = vst.msk [vmem:[%s2803_s2 + $0xa0] sm:$0xff] %vm1393_vm0, %v1570_v11  ;;  %1579 = vpow2.f32 %v1197_v8  ;;  %v1047_v15 = vmul.f32 %v922_v9, %v797_v2  ;;  %v799_v17 = vsub.f32 %v295_v13, %v1990_v1  ;;  %614 = vperm.xlu1 %1526, %v106_v5   ;;  %v115_v13 = vld [vmem:[%s2801_s0 + $0x340] sm:$0xff] }
  0xbf   :  { %v1046_v16 = vmul.f32 %v921_v10, %v796_v3  ;;  %1581 = vpow2.f32 %v1195_v12  ;;  %v798_v18 = vsub.f32 %v290_v14, %v1990_v1  ;;  %609 = vperm.xlu0 %1525, %v105_v6   ;;  %v116_v12 = vld [vmem:[%s2801_s0 + $0x348] sm:$0xff] }
  0xc0   :  { %v1572_v21 = vpop.eup %1571  ;;  %v1201_v22 = vmul.f32 1.442695, %v1047_v15  ;;  %v924_v24 = vmul.f32 -48.020004, %v799_v17 }
  0xc1   :  { %v1199_v23 = vmul.f32 1.442695, %v1046_v16  ;;  %v1574_v25 = vpop.eup %1573  ;;  %1417 = vst.msk [vmem:[%s2803_s2 + $0xb8] sm:$0xff] %vm1393_vm0, %v1572_v21  ;;  %v923_v26 = vmul.f32 -48.020004, %v798_v18  ;;  %v305_v27 = vpop.permute.xlu1 %304 }
  0xc2   :  { %v300_v28 = vpop.permute.xlu0 %299  ;;  %1416 = vst.msk [vmem:[%s2803_s2 + $0xb0] sm:$0xff] %vm1393_vm0, %v1574_v25  ;;  %1583 = vpow2.f32 %v1201_v22  ;;  %v1049_v29 = vmul.f32 %v924_v24, %v799_v17  ;;  %v801_v30 = vsub.f32 %v305_v27, %v1990_v1  ;;  %624 = vperm.xlu1 %1526, %v108_v19   ;;  %v117_v27 = vld [vmem:[%s2801_s0 + $0x350] sm:$0xff] }
  0xc3   :  { %v800_v31 = vsub.f32 %v300_v28, %v1990_v1  ;;  %1585 = vpow2.f32 %v1199_v23  ;;  %v1048_v32 = vmul.f32 %v923_v26, %v798_v18  ;;  %619 = vperm.xlu0 %1525, %v107_v20   ;;  %v118_v26 = vld [vmem:[%s2801_s0 + $0x358] sm:$0xff] }
  0xc4   :  { %v1576_v35 = vpop.eup %1575  ;;  %v1205_v36 = vmul.f32 1.442695, %v1049_v29  ;;  %v926_v37 = vmul.f32 -48.020004, %v801_v30 }
  0xc5   :  { %v925_v38 = vmul.f32 -48.020004, %v800_v31  ;;  %v1578_v39 = vpop.eup %1577  ;;  %1419 = vst.msk [vmem:[%s2803_s2 + $0xc8] sm:$0xff] %vm1393_vm0, %v1576_v35  ;;  %v1203_v40 = vmul.f32 1.442695, %v1048_v32  ;;  %v315_v41 = vpop.permute.xlu1 %314 }
  0xc6   :  { %v310_v42 = vpop.permute.xlu0 %309  ;;  %1418 = vst.msk [vmem:[%s2803_s2 + $0xc0] sm:$0xff] %vm1393_vm0, %v1578_v39  ;;  %1587 = vpow2.f32 %v1205_v36  ;;  %v1051_v43 = vmul.f32 %v926_v37, %v801_v30  ;;  %v803_v45 = vsub.f32 %v315_v41, %v1990_v1  ;;  %634 = vperm.xlu1 %1526, %v110_v33   ;;  %v119_v41 = vld [vmem:[%s2801_s0 + $0x360] sm:$0xff] }
  0xc7   :  { %v1050_v44 = vmul.f32 %v925_v38, %v800_v31  ;;  %1589 = vpow2.f32 %v1203_v40  ;;  %v802_v46 = vsub.f32 %v310_v42, %v1990_v1  ;;  %629 = vperm.xlu0 %1525, %v109_v34   ;;  %v120_v40 = vld [vmem:[%s2801_s0 + $0x368] sm:$0xff] }
  0xc8   :  { %v1580_v49 = vpop.eup %1579  ;;  %v1209_v50 = vmul.f32 1.442695, %v1051_v43  ;;  %v928_v52 = vmul.f32 -48.020004, %v803_v45 }
  0xc9   :  { %v1207_v51 = vmul.f32 1.442695, %v1050_v44  ;;  %v1582_v53 = vpop.eup %1581  ;;  %1421 = vst.msk [vmem:[%s2803_s2 + $0xd8] sm:$0xff] %vm1393_vm0, %v1580_v49  ;;  %v927_v54 = vmul.f32 -48.020004, %v802_v46  ;;  %v325_v55 = vpop.permute.xlu1 %324 }
  0xca   :  { %v320_v56 = vpop.permute.xlu0 %319  ;;  %1420 = vst.msk [vmem:[%s2803_s2 + $0xd0] sm:$0xff] %vm1393_vm0, %v1582_v53  ;;  %1591 = vpow2.f32 %v1209_v50  ;;  %v1053_v57 = vmul.f32 %v928_v52, %v803_v45  ;;  %v805_v58 = vsub.f32 %v325_v55, %v1990_v1  ;;  %644 = vperm.xlu1 %1526, %v112_v47   ;;  %v121_v55 = vld [vmem:[%s2801_s0 + $0x370] sm:$0xff] }
  0xcb   :  { %v804_v59 = vsub.f32 %v320_v56, %v1990_v1  ;;  %1593 = vpow2.f32 %v1207_v51  ;;  %v1052_v60 = vmul.f32 %v927_v54, %v802_v46  ;;  %639 = vperm.xlu0 %1525, %v111_v48   ;;  %v122_v54 = vld [vmem:[%s2801_s0 + $0x378] sm:$0xff] }
  0xcc   :  { %v1584_v63 = vpop.eup %1583  ;;  %v1213_v0 = vmul.f32 1.442695, %v1053_v57  ;;  %v930_v2 = vmul.f32 -48.020004, %v805_v58 }
  0xcd   :  { %v929_v3 = vmul.f32 -48.020004, %v804_v59  ;;  %v1586_v4 = vpop.eup %1585  ;;  %1423 = vst.msk [vmem:[%s2803_s2 + $0xe8] sm:$0xff] %vm1393_vm0, %v1584_v63  ;;  %v1211_v5 = vmul.f32 1.442695, %v1052_v60  ;;  %v335_v6 = vpop.permute.xlu1 %334 }
  0xce   :  { %v330_v7 = vpop.permute.xlu0 %329  ;;  %1422 = vst.msk [vmem:[%s2803_s2 + $0xe0] sm:$0xff] %vm1393_vm0, %v1586_v4  ;;  %1595 = vpow2.f32 %v1213_v0  ;;  %v1055_v8 = vmul.f32 %v930_v2, %v805_v58  ;;  %v807_v10 = vsub.f32 %v335_v6, %v1990_v1  ;;  %654 = vperm.xlu1 %1526, %v114_v61   ;;  %v123_v6 = vld [vmem:[%s2801_s0 + $0x380] sm:$0xff] }
  0xcf   :  { %v1054_v9 = vmul.f32 %v929_v3, %v804_v59  ;;  %1597 = vpow2.f32 %v1211_v5  ;;  %v806_v11 = vsub.f32 %v330_v7, %v1990_v1  ;;  %649 = vperm.xlu0 %1525, %v113_v62   ;;  %v124_v5 = vld [vmem:[%s2801_s0 + $0x388] sm:$0xff] }
  0xd0   :  { %v1588_v14 = vpop.eup %1587  ;;  %v1217_v15 = vmul.f32 1.442695, %v1055_v8  ;;  %v932_v17 = vmul.f32 -48.020004, %v807_v10 }
  0xd1   :  { %v1215_v16 = vmul.f32 1.442695, %v1054_v9  ;;  %v1590_v18 = vpop.eup %1589  ;;  %1425 = vst.msk [vmem:[%s2803_s2 + $0xf8] sm:$0xff] %vm1393_vm0, %v1588_v14  ;;  %v931_v19 = vmul.f32 -48.020004, %v806_v11  ;;  %v345_v20 = vpop.permute.xlu1 %344 }
  0xd2   :  { %v340_v21 = vpop.permute.xlu0 %339  ;;  %1424 = vst.msk [vmem:[%s2803_s2 + $0xf0] sm:$0xff] %vm1393_vm0, %v1590_v18  ;;  %1599 = vpow2.f32 %v1217_v15  ;;  %v1057_v22 = vmul.f32 %v932_v17, %v807_v10  ;;  %v809_v23 = vsub.f32 %v345_v20, %v1990_v1  ;;  %664 = vperm.xlu1 %1526, %v116_v12   ;;  %v125_v20 = vld [vmem:[%s2801_s0 + $0x390] sm:$0xff] }
  0xd3   :  { %v808_v24 = vsub.f32 %v340_v21, %v1990_v1  ;;  %1601 = vpow2.f32 %v1215_v16  ;;  %v1056_v25 = vmul.f32 %v931_v19, %v806_v11  ;;  %659 = vperm.xlu0 %1525, %v115_v13   ;;  %v126_v19 = vld [vmem:[%s2801_s0 + $0x398] sm:$0xff] }
  0xd4   :  { %v1592_v28 = vpop.eup %1591  ;;  %v1221_v29 = vmul.f32 1.442695, %v1057_v22  ;;  %v934_v30 = vmul.f32 -48.020004, %v809_v23 }
  0xd5   :  { %v933_v31 = vmul.f32 -48.020004, %v808_v24  ;;  %v1594_v32 = vpop.eup %1593  ;;  %1427 = vst.msk [vmem:[%s2803_s2 + $0x108] sm:$0xff] %vm1393_vm0, %v1592_v28  ;;  %v1219_v33 = vmul.f32 1.442695, %v1056_v25  ;;  %v355_v34 = vpop.permute.xlu1 %354 }
  0xd6   :  { %v350_v35 = vpop.permute.xlu0 %349  ;;  %1426 = vst.msk [vmem:[%s2803_s2 + $0x100] sm:$0xff] %vm1393_vm0, %v1594_v32  ;;  %1603 = vpow2.f32 %v1221_v29  ;;  %v1059_v36 = vmul.f32 %v934_v30, %v809_v23  ;;  %v811_v38 = vsub.f32 %v355_v34, %v1990_v1  ;;  %674 = vperm.xlu1 %1526, %v118_v26   ;;  %v127_v34 = vld [vmem:[%s2801_s0 + $0x3a0] sm:$0xff] }
  0xd7   :  { %v1058_v37 = vmul.f32 %v933_v31, %v808_v24  ;;  %1605 = vpow2.f32 %v1219_v33  ;;  %v810_v39 = vsub.f32 %v350_v35, %v1990_v1  ;;  %669 = vperm.xlu0 %1525, %v117_v27   ;;  %v128_v33 = vld [vmem:[%s2801_s0 + $0x3a8] sm:$0xff] }
  0xd8   :  { %v1596_v42 = vpop.eup %1595  ;;  %v1225_v43 = vmul.f32 1.442695, %v1059_v36  ;;  %v936_v45 = vmul.f32 -48.020004, %v811_v38 }
  0xd9   :  { %v1223_v44 = vmul.f32 1.442695, %v1058_v37  ;;  %v1598_v46 = vpop.eup %1597  ;;  %1429 = vst.msk [vmem:[%s2803_s2 + $0x118] sm:$0xff] %vm1393_vm0, %v1596_v42  ;;  %v935_v47 = vmul.f32 -48.020004, %v810_v39  ;;  %v365_v48 = vpop.permute.xlu1 %364 }
  0xda   :  { %v360_v49 = vpop.permute.xlu0 %359  ;;  %1428 = vst.msk [vmem:[%s2803_s2 + $0x110] sm:$0xff] %vm1393_vm0, %v1598_v46  ;;  %1607 = vpow2.f32 %v1225_v43  ;;  %v1061_v50 = vmul.f32 %v936_v45, %v811_v38  ;;  %v813_v51 = vsub.f32 %v365_v48, %v1990_v1  ;;  %684 = vperm.xlu1 %1526, %v120_v40   ;;  %v129_v48 = vld [vmem:[%s2801_s0 + $0x3b0] sm:$0xff] }
  0xdb   :  { %v812_v52 = vsub.f32 %v360_v49, %v1990_v1  ;;  %1609 = vpow2.f32 %v1223_v44  ;;  %v1060_v53 = vmul.f32 %v935_v47, %v810_v39  ;;  %679 = vperm.xlu0 %1525, %v119_v41   ;;  %v130_v47 = vld [vmem:[%s2801_s0 + $0x3b8] sm:$0xff] }
  0xdc   :  { %v1600_v56 = vpop.eup %1599  ;;  %v1229_v57 = vmul.f32 1.442695, %v1061_v50  ;;  %v938_v58 = vmul.f32 -48.020004, %v813_v51 }
  0xdd   :  { %v937_v59 = vmul.f32 -48.020004, %v812_v52  ;;  %v1602_v60 = vpop.eup %1601  ;;  %1431 = vst.msk [vmem:[%s2803_s2 + $0x128] sm:$0xff] %vm1393_vm0, %v1600_v56  ;;  %v1227_v61 = vmul.f32 1.442695, %v1060_v53  ;;  %v375_v62 = vpop.permute.xlu1 %374 }
  0xde   :  { %v370_v63 = vpop.permute.xlu0 %369  ;;  %1430 = vst.msk [vmem:[%s2803_s2 + $0x120] sm:$0xff] %vm1393_vm0, %v1602_v60  ;;  %1611 = vpow2.f32 %v1229_v57  ;;  %v1063_v0 = vmul.f32 %v938_v58, %v813_v51  ;;  %v815_v3 = vsub.f32 %v375_v62, %v1990_v1  ;;  %694 = vperm.xlu1 %1526, %v122_v54   ;;  %v2401_v58 = vld [vmem:[%s2802_s1] ss:$0 sm:$0xff] }
  0xdf   :  { %v1062_v2 = vmul.f32 %v937_v59, %v812_v52  ;;  %1613 = vpow2.f32 %v1227_v61  ;;  %v814_v4 = vsub.f32 %v370_v63, %v1990_v1  ;;  %689 = vperm.xlu0 %1525, %v121_v55   ;;  %v132_v61 = vld [vmem:[%s2801_s0 + $0x3c8] sm:$0xff]  ;;  %v131_v62 = vld [vmem:[%s2801_s0 + $0x3c0] sm:$0xff] }
  0xe0   :  { %v1604_v7 = vpop.eup %1603  ;;  %v1233_v8 = vmul.f32 1.442695, %v1063_v0  ;;  %v940_v10 = vmul.f32 -48.020004, %v815_v3 }
  0xe1   :  { %v1231_v9 = vmul.f32 1.442695, %v1062_v2  ;;  %v1606_v11 = vpop.eup %1605  ;;  %1433 = vst.msk [vmem:[%s2803_s2 + $0x138] sm:$0xff] %vm1393_vm0, %v1604_v7  ;;  %v939_v12 = vmul.f32 -48.020004, %v814_v4  ;;  %v385_v13 = vpop.permute.xlu1 %384 }
  0xe2   :  { %v380_v14 = vpop.permute.xlu0 %379  ;;  %1432 = vst.msk [vmem:[%s2803_s2 + $0x130] sm:$0xff] %vm1393_vm0, %v1606_v11  ;;  %1615 = vpow2.f32 %v1233_v8  ;;  %v1065_v15 = vmul.f32 %v940_v10, %v815_v3  ;;  %v817_v16 = vsub.f32 %v385_v13, %v1990_v1  ;;  %704 = vperm.xlu1 %1526, %v124_v5   ;;  %v133_v13 = vld [vmem:[%s2801_s0 + $0x3d0] sm:$0xff] }
  0xe3   :  { %v816_v17 = vsub.f32 %v380_v14, %v1990_v1  ;;  %1617 = vpow2.f32 %v1231_v9  ;;  %v1064_v18 = vmul.f32 %v939_v12, %v814_v4  ;;  %699 = vperm.xlu0 %1525, %v123_v6   ;;  %v134_v12 = vld [vmem:[%s2801_s0 + $0x3d8] sm:$0xff] }
  0xe4   :  { %v1608_v21 = vpop.eup %1607  ;;  %v1237_v22 = vmul.f32 1.442695, %v1065_v15  ;;  %v942_v23 = vmul.f32 -48.020004, %v817_v16 }
  0xe5   :  { %v941_v24 = vmul.f32 -48.020004, %v816_v17  ;;  %v1610_v25 = vpop.eup %1609  ;;  %1435 = vst.msk [vmem:[%s2803_s2 + $0x148] sm:$0xff] %vm1393_vm0, %v1608_v21  ;;  %v1235_v26 = vmul.f32 1.442695, %v1064_v18  ;;  %v395_v27 = vpop.permute.xlu1 %394 }
  0xe6   :  { %v390_v28 = vpop.permute.xlu0 %389  ;;  %1434 = vst.msk [vmem:[%s2803_s2 + $0x140] sm:$0xff] %vm1393_vm0, %v1610_v25  ;;  %1619 = vpow2.f32 %v1237_v22  ;;  %v1067_v29 = vmul.f32 %v942_v23, %v817_v16  ;;  %v819_v31 = vsub.f32 %v395_v27, %v1990_v1  ;;  %714 = vperm.xlu1 %1526, %v126_v19  }
  0xe7   :  { %v1066_v30 = vmul.f32 %v941_v24, %v816_v17  ;;  %1621 = vpow2.f32 %v1235_v26  ;;  %v818_v32 = vsub.f32 %v390_v28, %v1990_v1  ;;  %709 = vperm.xlu0 %1525, %v125_v20   ;;  %v135_v26 = vld [vmem:[%s2801_s0 + $0x3e0] sm:$0xff] }
  0xe8   :  { %v1612_v35 = vpop.eup %1611  ;;  %v1241_v36 = vmul.f32 1.442695, %v1067_v29  ;;  %v944_v38 = vmul.f32 -48.020004, %v819_v31 }
  0xe9   :  { %v1239_v37 = vmul.f32 1.442695, %v1066_v30  ;;  %v1614_v39 = vpop.eup %1613  ;;  %1437 = vst.msk [vmem:[%s2803_s2 + $0x158] sm:$0xff] %vm1393_vm0, %v1612_v35  ;;  %v943_v40 = vmul.f32 -48.020004, %v818_v32  ;;  %v405_v41 = vpop.permute.xlu1 %404 }
  0xea   :  { %v400_v42 = vpop.permute.xlu0 %399  ;;  %1436 = vst.msk [vmem:[%s2803_s2 + $0x150] sm:$0xff] %vm1393_vm0, %v1614_v39  ;;  %1623 = vpow2.f32 %v1241_v36  ;;  %v1069_v43 = vmul.f32 %v944_v38, %v819_v31  ;;  %v821_v44 = vsub.f32 %v405_v41, %v1990_v1  ;;  %724 = vperm.xlu1 %1526, %v128_v33  }
  0xeb   :  { %v820_v45 = vsub.f32 %v400_v42, %v1990_v1  ;;  %1625 = vpow2.f32 %v1239_v37  ;;  %v1068_v46 = vmul.f32 %v943_v40, %v818_v32  ;;  %719 = vperm.xlu0 %1525, %v127_v34  }
  0xec   :  { %v1616_v49 = vpop.eup %1615  ;;  %v1245_v50 = vmul.f32 1.442695, %v1069_v43  ;;  %v946_v51 = vmul.f32 -48.020004, %v821_v44 }
  0xed   :  { %v945_v52 = vmul.f32 -48.020004, %v820_v45  ;;  %v1618_v53 = vpop.eup %1617  ;;  %1439 = vst.msk [vmem:[%s2803_s2 + $0x168] sm:$0xff] %vm1393_vm0, %v1616_v49  ;;  %v1243_v1 = vmul.f32 1.442695, %v1068_v46  ;;  %v415_v54 = vpop.permute.xlu1 %414 }
  0xee   :  { %v410_v55 = vpop.permute.xlu0 %409  ;;  %1438 = vst.msk [vmem:[%s2803_s2 + $0x160] sm:$0xff] %vm1393_vm0, %v1618_v53  ;;  %1627 = vpow2.f32 %v1245_v50  ;;  %v1071_v56 = vmul.f32 %v946_v51, %v821_v44  ;;  %v823_v59 = vsub.f32 %v415_v54, %v2401_v58  ;;  %734 = vperm.xlu1 %1526, %v130_v47  }
  0xef   :  { %v1070_v57 = vmul.f32 %v945_v52, %v820_v45  ;;  %1629 = vpow2.f32 %v1243_v1  ;;  %v822_v60 = vsub.f32 %v410_v55, %v2401_v58  ;;  %729 = vperm.xlu0 %1525, %v129_v48  }
  0xf0   :  { %v1620_v63 = vpop.eup %1619  ;;  %v1249_v0 = vmul.f32 1.442695, %v1071_v56  ;;  %v948_v3 = vmul.f32 -48.020004, %v823_v59 }
  0xf1   :  { %v1247_v2 = vmul.f32 1.442695, %v1070_v57  ;;  %v1622_v4 = vpop.eup %1621  ;;  %1441 = vst.msk [vmem:[%s2803_s2 + $0x178] sm:$0xff] %vm1393_vm0, %v1620_v63  ;;  %v947_v5 = vmul.f32 -48.020004, %v822_v60  ;;  %v425_v6 = vpop.permute.xlu1 %424 }
  0xf2   :  { %v420_v7 = vpop.permute.xlu0 %419  ;;  %1440 = vst.msk [vmem:[%s2803_s2 + $0x170] sm:$0xff] %vm1393_vm0, %v1622_v4  ;;  %1631 = vpow2.f32 %v1249_v0  ;;  %v1073_v8 = vmul.f32 %v948_v3, %v823_v59  ;;  %v825_v9 = vsub.f32 %v425_v6, %v2401_v58  ;;  %744 = vperm.xlu1 %1526, %v132_v61  }
  0xf3   :  { %v824_v10 = vsub.f32 %v420_v7, %v2401_v58  ;;  %1633 = vpow2.f32 %v1247_v2  ;;  %v1072_v11 = vmul.f32 %v947_v5, %v822_v60  ;;  %739 = vperm.xlu0 %1525, %v131_v62  }
  0xf4   :  { %v1624_v14 = vpop.eup %1623  ;;  %v1253_v15 = vmul.f32 1.442695, %v1073_v8  ;;  %v950_v16 = vmul.f32 -48.020004, %v825_v9 }
  0xf5   :  { %v949_v17 = vmul.f32 -48.020004, %v824_v10  ;;  %v1626_v18 = vpop.eup %1625  ;;  %1443 = vst.msk [vmem:[%s2803_s2 + $0x188] sm:$0xff] %vm1393_vm0, %v1624_v14  ;;  %v1251_v19 = vmul.f32 1.442695, %v1072_v11  ;;  %v435_v20 = vpop.permute.xlu1 %434 }
  0xf6   :  { %v430_v21 = vpop.permute.xlu0 %429  ;;  %1442 = vst.msk [vmem:[%s2803_s2 + $0x180] sm:$0xff] %vm1393_vm0, %v1626_v18  ;;  %1635 = vpow2.f32 %v1253_v15  ;;  %v1075_v22 = vmul.f32 %v950_v16, %v825_v9  ;;  %v827_v24 = vsub.f32 %v435_v20, %v2401_v58  ;;  %754 = vperm.xlu1 %1526, %v134_v12  }
  0xf7   :  { %v1074_v23 = vmul.f32 %v949_v17, %v824_v10  ;;  %1637 = vpow2.f32 %v1251_v19  ;;  %v826_v25 = vsub.f32 %v430_v21, %v2401_v58  ;;  %749 = vperm.xlu0 %1525, %v133_v13  }
  0xf8   :  { %v1628_v27 = vpop.eup %1627  ;;  %v1257_v28 = vmul.f32 1.442695, %v1075_v22  ;;  %v952_v30 = vmul.f32 -48.020004, %v827_v24 }
  0xf9   :  { %v1255_v29 = vmul.f32 1.442695, %v1074_v23  ;;  %v1630_v31 = vpop.eup %1629  ;;  %1445 = vst.msk [vmem:[%s2803_s2 + $0x198] sm:$0xff] %vm1393_vm0, %v1628_v27  ;;  %v951_v32 = vmul.f32 -48.020004, %v826_v25  ;;  %v445_v33 = vpop.permute.xlu1 %444 }
  0xfa   :  { %v440_v34 = vpop.permute.xlu0 %439  ;;  %1444 = vst.msk [vmem:[%s2803_s2 + $0x190] sm:$0xff] %vm1393_vm0, %v1630_v31  ;;  %1639 = vpow2.f32 %v1257_v28  ;;  %v1077_v35 = vmul.f32 %v952_v30, %v827_v24  ;;  %v829_v36 = vsub.f32 %v445_v33, %v2401_v58 }
  0xfb   :  { %v828_v37 = vsub.f32 %v440_v34, %v2401_v58  ;;  %1641 = vpow2.f32 %v1255_v29  ;;  %v1076_v38 = vmul.f32 %v951_v32, %v826_v25  ;;  %759 = vperm.xlu0 %1525, %v135_v26  }
  0xfc   :  { %v1632_v39 = vpop.eup %1631  ;;  %v1261_v40 = vmul.f32 1.442695, %v1077_v35  ;;  %v954_v41 = vmul.f32 -48.020004, %v829_v36 }
  0xfd   :  { %v953_v42 = vmul.f32 -48.020004, %v828_v37  ;;  %v1634_v43 = vpop.eup %1633  ;;  %1447 = vst.msk [vmem:[%s2803_s2 + $0x1a8] sm:$0xff] %vm1393_vm0, %v1632_v39  ;;  %v1259_v44 = vmul.f32 1.442695, %v1076_v38  ;;  %v455_v45 = vpop.permute.xlu1 %454 }
  0xfe   :  { %v450_v46 = vpop.permute.xlu0 %449  ;;  %1446 = vst.msk [vmem:[%s2803_s2 + $0x1a0] sm:$0xff] %vm1393_vm0, %v1634_v43  ;;  %1643 = vpow2.f32 %v1261_v40  ;;  %v1079_v47 = vmul.f32 %v954_v41, %v829_v36  ;;  %v831_v49 = vsub.f32 %v455_v45, %v2401_v58 }
  0xff   :  { %v1078_v48 = vmul.f32 %v953_v42, %v828_v37  ;;  %1645 = vpow2.f32 %v1259_v44  ;;  %v830_v50 = vsub.f32 %v450_v46, %v2401_v58 }
 0x100   :  { %v1636_v51 = vpop.eup %1635  ;;  %v1265_v52 = vmul.f32 1.442695, %v1079_v47  ;;  %v956_v1 = vmul.f32 -48.020004, %v831_v49 }
 0x101   :  { %v1263_v53 = vmul.f32 1.442695, %v1078_v48  ;;  %v1638_v54 = vpop.eup %1637  ;;  %1449 = vst.msk [vmem:[%s2803_s2 + $0x1b8] sm:$0xff] %vm1393_vm0, %v1636_v51  ;;  %v955_v55 = vmul.f32 -48.020004, %v830_v50  ;;  %v465_v56 = vpop.permute.xlu1 %464 }
 0x102   :  { %v460_v57 = vpop.permute.xlu0 %459  ;;  %1448 = vst.msk [vmem:[%s2803_s2 + $0x1b0] sm:$0xff] %vm1393_vm0, %v1638_v54  ;;  %1647 = vpow2.f32 %v1265_v52  ;;  %v1081_v59 = vmul.f32 %v956_v1, %v831_v49  ;;  %v833_v60 = vsub.f32 %v465_v56, %v2401_v58 }
 0x103   :  { %v832_v61 = vsub.f32 %v460_v57, %v2401_v58  ;;  %1649 = vpow2.f32 %v1263_v53  ;;  %v1080_v62 = vmul.f32 %v955_v55, %v830_v50 }
 0x104   :  { %v1640_v63 = vpop.eup %1639  ;;  %v1269_v0 = vmul.f32 1.442695, %v1081_v59  ;;  %v958_v2 = vmul.f32 -48.020004, %v833_v60 }
 0x105   :  { %v957_v3 = vmul.f32 -48.020004, %v832_v61  ;;  %v1642_v4 = vpop.eup %1641  ;;  %1451 = vst.msk [vmem:[%s2803_s2 + $0x1c8] sm:$0xff] %vm1393_vm0, %v1640_v63  ;;  %v1267_v5 = vmul.f32 1.442695, %v1080_v62  ;;  %v475_v6 = vpop.permute.xlu1 %474 }
 0x106   :  { %1450 = vst.msk [vmem:[%s2803_s2 + $0x1c0] sm:$0xff] %vm1393_vm0, %v1642_v4  ;;  %1651 = vpow2.f32 %v1269_v0  ;;  %v1083_v7 = vmul.f32 %v958_v2, %v833_v60  ;;  %v835_v9 = vsub.f32 %v475_v6, %v2401_v58  ;;  %v470_v10 = vpop.permute.xlu0 %469 }
 0x107   :  { %v1082_v8 = vmul.f32 %v957_v3, %v832_v61  ;;  %1653 = vpow2.f32 %v1267_v5  ;;  %v834_v11 = vsub.f32 %v470_v10, %v2401_v58 }
 0x108   :  { %v1644_v12 = vpop.eup %1643  ;;  %v1273_v13 = vmul.f32 1.442695, %v1083_v7  ;;  %v960_v15 = vmul.f32 -48.020004, %v835_v9 }
 0x109   :  { %v1271_v14 = vmul.f32 1.442695, %v1082_v8  ;;  %v1646_v16 = vpop.eup %1645  ;;  %1453 = vst.msk [vmem:[%s2803_s2 + $0x1d8] sm:$0xff] %vm1393_vm0, %v1644_v12  ;;  %v959_v17 = vmul.f32 -48.020004, %v834_v11  ;;  %v485_v18 = vpop.permute.xlu1 %484 }
 0x10a   :  { %1452 = vst.msk [vmem:[%s2803_s2 + $0x1d0] sm:$0xff] %vm1393_vm0, %v1646_v16  ;;  %1655 = vpow2.f32 %v1273_v13  ;;  %v1085_v19 = vmul.f32 %v960_v15, %v835_v9  ;;  %v837_v20 = vsub.f32 %v485_v18, %v2401_v58  ;;  %v480_v21 = vpop.permute.xlu0 %479 }
 0x10b   :  { %1657 = vpow2.f32 %v1271_v14  ;;  %v1084_v22 = vmul.f32 %v959_v17, %v834_v11  ;;  %v836_v23 = vsub.f32 %v480_v21, %v2401_v58 }
 0x10c   :  { %v1648_v24 = vpop.eup %1647  ;;  %v1277_v25 = vmul.f32 1.442695, %v1085_v19  ;;  %v962_v26 = vmul.f32 -48.020004, %v837_v20 }
 0x10d   :  { %v1650_v27 = vpop.eup %1649  ;;  %1455 = vst.msk [vmem:[%s2803_s2 + $0x1e8] sm:$0xff] %vm1393_vm0, %v1648_v24  ;;  %v1275_v28 = vmul.f32 1.442695, %v1084_v22  ;;  %v961_v29 = vmul.f32 -48.020004, %v836_v23  ;;  %v495_v30 = vpop.permute.xlu1 %494 }
 0x10e   :  { %1454 = vst.msk [vmem:[%s2803_s2 + $0x1e0] sm:$0xff] %vm1393_vm0, %v1650_v27  ;;  %1659 = vpow2.f32 %v1277_v25  ;;  %v1087_v31 = vmul.f32 %v962_v26, %v837_v20  ;;  %v839_v32 = vsub.f32 %v495_v30, %v2401_v58  ;;  %v490_v33 = vpop.permute.xlu0 %489 }
 0x10f   :  { %1661 = vpow2.f32 %v1275_v28  ;;  %v1086_v34 = vmul.f32 %v961_v29, %v836_v23  ;;  %v838_v35 = vsub.f32 %v490_v33, %v2401_v58 }
 0x110   :  { %v1652_v36 = vpop.eup %1651  ;;  %v1281_v37 = vmul.f32 1.442695, %v1087_v31  ;;  %v964_v38 = vmul.f32 -48.020004, %v839_v32 }
 0x111   :  { %v1654_v39 = vpop.eup %1653  ;;  %1457 = vst.msk [vmem:[%s2803_s2 + $0x1f8] sm:$0xff] %vm1393_vm0, %v1652_v36  ;;  %v1279_v40 = vmul.f32 1.442695, %v1086_v34  ;;  %v963_v41 = vmul.f32 -48.020004, %v838_v35  ;;  %v505_v42 = vpop.permute.xlu1 %504 }
 0x112   :  { %1456 = vst.msk [vmem:[%s2803_s2 + $0x1f0] sm:$0xff] %vm1393_vm0, %v1654_v39  ;;  %1663 = vpow2.f32 %v1281_v37  ;;  %v1089_v43 = vmul.f32 %v964_v38, %v839_v32  ;;  %v841_v44 = vsub.f32 %v505_v42, %v2401_v58  ;;  %v500_v45 = vpop.permute.xlu0 %499 }
 0x113   :  { %1665 = vpow2.f32 %v1279_v40  ;;  %v1088_v46 = vmul.f32 %v963_v41, %v838_v35  ;;  %v840_v47 = vsub.f32 %v500_v45, %v2401_v58 }
 0x114   :  { %v1656_v48 = vpop.eup %1655  ;;  %v1285_v49 = vmul.f32 1.442695, %v1089_v43  ;;  %v966_v50 = vmul.f32 -48.020004, %v841_v44 }
 0x115   :  { %v1658_v51 = vpop.eup %1657  ;;  %1459 = vst.msk [vmem:[%s2803_s2 + $0x208] sm:$0xff] %vm1393_vm0, %v1656_v48  ;;  %v1283_v52 = vmul.f32 1.442695, %v1088_v46  ;;  %v965_v53 = vmul.f32 -48.020004, %v840_v47  ;;  %v515_v1 = vpop.permute.xlu1 %514 }
 0x116   :  { %1458 = vst.msk [vmem:[%s2803_s2 + $0x200] sm:$0xff] %vm1393_vm0, %v1658_v51  ;;  %1667 = vpow2.f32 %v1285_v49  ;;  %v1091_v54 = vmul.f32 %v966_v50, %v841_v44  ;;  %v843_v55 = vsub.f32 %v515_v1, %v2401_v58  ;;  %v510_v56 = vpop.permute.xlu0 %509 }
 0x117   :  { %1669 = vpow2.f32 %v1283_v52  ;;  %v1090_v57 = vmul.f32 %v965_v53, %v840_v47  ;;  %v842_v59 = vsub.f32 %v510_v56, %v2401_v58 }
 0x118   :  { %v1660_v60 = vpop.eup %1659  ;;  %v1289_v61 = vmul.f32 1.442695, %v1091_v54  ;;  %v968_v62 = vmul.f32 -48.020004, %v843_v55 }
 0x119   :  { %v1662_v63 = vpop.eup %1661  ;;  %1461 = vst.msk [vmem:[%s2803_s2 + $0x218] sm:$0xff] %vm1393_vm0, %v1660_v60  ;;  %v1287_v0 = vmul.f32 1.442695, %v1090_v57  ;;  %v967_v2 = vmul.f32 -48.020004, %v842_v59  ;;  %v525_v3 = vpop.permute.xlu1 %524 }
 0x11a   :  { %1460 = vst.msk [vmem:[%s2803_s2 + $0x210] sm:$0xff] %vm1393_vm0, %v1662_v63  ;;  %1671 = vpow2.f32 %v1289_v61  ;;  %v1093_v4 = vmul.f32 %v968_v62, %v843_v55  ;;  %v845_v5 = vsub.f32 %v525_v3, %v2401_v58  ;;  %v520_v6 = vpop.permute.xlu0 %519 }
 0x11b   :  { %1673 = vpow2.f32 %v1287_v0  ;;  %v1092_v7 = vmul.f32 %v967_v2, %v842_v59  ;;  %v844_v8 = vsub.f32 %v520_v6, %v2401_v58 }
 0x11c   :  { %v1664_v9 = vpop.eup %1663  ;;  %v1293_v10 = vmul.f32 1.442695, %v1093_v4  ;;  %v970_v11 = vmul.f32 -48.020004, %v845_v5 }
 0x11d   :  { %v1666_v12 = vpop.eup %1665  ;;  %1463 = vst.msk [vmem:[%s2803_s2 + $0x228] sm:$0xff] %vm1393_vm0, %v1664_v9  ;;  %v1291_v13 = vmul.f32 1.442695, %v1092_v7  ;;  %v969_v14 = vmul.f32 -48.020004, %v844_v8  ;;  %v535_v15 = vpop.permute.xlu1 %534 }
 0x11e   :  { %1462 = vst.msk [vmem:[%s2803_s2 + $0x220] sm:$0xff] %vm1393_vm0, %v1666_v12  ;;  %1675 = vpow2.f32 %v1293_v10  ;;  %v1095_v16 = vmul.f32 %v970_v11, %v845_v5  ;;  %v847_v17 = vsub.f32 %v535_v15, %v2401_v58  ;;  %v530_v18 = vpop.permute.xlu0 %529 }
 0x11f   :  { %1677 = vpow2.f32 %v1291_v13  ;;  %v1094_v19 = vmul.f32 %v969_v14, %v844_v8  ;;  %v846_v20 = vsub.f32 %v530_v18, %v2401_v58 }
 0x120   :  { %v1668_v21 = vpop.eup %1667  ;;  %v1297_v22 = vmul.f32 1.442695, %v1095_v16  ;;  %v972_v23 = vmul.f32 -48.020004, %v847_v17 }
 0x121   :  { %v1670_v24 = vpop.eup %1669  ;;  %1465 = vst.msk [vmem:[%s2803_s2 + $0x238] sm:$0xff] %vm1393_vm0, %v1668_v21  ;;  %v1295_v25 = vmul.f32 1.442695, %v1094_v19  ;;  %v971_v26 = vmul.f32 -48.020004, %v846_v20  ;;  %v545_v27 = vpop.permute.xlu1 %544 }
 0x122   :  { %1464 = vst.msk [vmem:[%s2803_s2 + $0x230] sm:$0xff] %vm1393_vm0, %v1670_v24  ;;  %1679 = vpow2.f32 %v1297_v22  ;;  %v1097_v28 = vmul.f32 %v972_v23, %v847_v17  ;;  %v849_v29 = vsub.f32 %v545_v27, %v2401_v58  ;;  %v540_v30 = vpop.permute.xlu0 %539 }
 0x123   :  { %1681 = vpow2.f32 %v1295_v25  ;;  %v1096_v31 = vmul.f32 %v971_v26, %v846_v20  ;;  %v848_v32 = vsub.f32 %v540_v30, %v2401_v58 }
 0x124   :  { %v1672_v33 = vpop.eup %1671  ;;  %v1301_v34 = vmul.f32 1.442695, %v1097_v28  ;;  %v974_v35 = vmul.f32 -48.020004, %v849_v29 }
 0x125   :  { %v1674_v36 = vpop.eup %1673  ;;  %1467 = vst.msk [vmem:[%s2803_s2 + $0x248] sm:$0xff] %vm1393_vm0, %v1672_v33  ;;  %v1299_v37 = vmul.f32 1.442695, %v1096_v31  ;;  %v973_v38 = vmul.f32 -48.020004, %v848_v32  ;;  %v555_v39 = vpop.permute.xlu1 %554 }
 0x126   :  { %1466 = vst.msk [vmem:[%s2803_s2 + $0x240] sm:$0xff] %vm1393_vm0, %v1674_v36  ;;  %1683 = vpow2.f32 %v1301_v34  ;;  %v1099_v40 = vmul.f32 %v974_v35, %v849_v29  ;;  %v851_v41 = vsub.f32 %v555_v39, %v2401_v58  ;;  %v550_v42 = vpop.permute.xlu0 %549 }
 0x127   :  { %1685 = vpow2.f32 %v1299_v37  ;;  %v1098_v43 = vmul.f32 %v973_v38, %v848_v32  ;;  %v850_v44 = vsub.f32 %v550_v42, %v2401_v58 }
 0x128   :  { %v1676_v45 = vpop.eup %1675  ;;  %v1305_v46 = vmul.f32 1.442695, %v1099_v40  ;;  %v976_v47 = vmul.f32 -48.020004, %v851_v41 }
 0x129   :  { %v1678_v48 = vpop.eup %1677  ;;  %1469 = vst.msk [vmem:[%s2803_s2 + $0x258] sm:$0xff] %vm1393_vm0, %v1676_v45  ;;  %v1303_v49 = vmul.f32 1.442695, %v1098_v43  ;;  %v975_v50 = vmul.f32 -48.020004, %v850_v44  ;;  %v565_v51 = vpop.permute.xlu1 %564 }
 0x12a   :  { %1468 = vst.msk [vmem:[%s2803_s2 + $0x250] sm:$0xff] %vm1393_vm0, %v1678_v48  ;;  %1687 = vpow2.f32 %v1305_v46  ;;  %v1101_v52 = vmul.f32 %v976_v47, %v851_v41  ;;  %v853_v53 = vsub.f32 %v565_v51, %v2401_v58  ;;  %v560_v1 = vpop.permute.xlu0 %559 }
 0x12b   :  { %1689 = vpow2.f32 %v1303_v49  ;;  %v1100_v54 = vmul.f32 %v975_v50, %v850_v44  ;;  %v852_v55 = vsub.f32 %v560_v1, %v2401_v58 }
 0x12c   :  { %v1680_v56 = vpop.eup %1679  ;;  %v1309_v57 = vmul.f32 1.442695, %v1101_v52  ;;  %v978_v59 = vmul.f32 -48.020004, %v853_v53 }
 0x12d   :  { %v1682_v60 = vpop.eup %1681  ;;  %1471 = vst.msk [vmem:[%s2803_s2 + $0x268] sm:$0xff] %vm1393_vm0, %v1680_v56  ;;  %v1307_v61 = vmul.f32 1.442695, %v1100_v54  ;;  %v977_v62 = vmul.f32 -48.020004, %v852_v55  ;;  %v575_v63 = vpop.permute.xlu1 %574 }
 0x12e   :  { %1470 = vst.msk [vmem:[%s2803_s2 + $0x260] sm:$0xff] %vm1393_vm0, %v1682_v60  ;;  %1691 = vpow2.f32 %v1309_v57  ;;  %v1103_v0 = vmul.f32 %v978_v59, %v853_v53  ;;  %v855_v2 = vsub.f32 %v575_v63, %v2401_v58  ;;  %v570_v3 = vpop.permute.xlu0 %569 }
 0x12f   :  { %1693 = vpow2.f32 %v1307_v61  ;;  %v1102_v4 = vmul.f32 %v977_v62, %v852_v55  ;;  %v854_v5 = vsub.f32 %v570_v3, %v2401_v58 }
 0x130   :  { %v1684_v6 = vpop.eup %1683  ;;  %v1313_v7 = vmul.f32 1.442695, %v1103_v0  ;;  %v980_v8 = vmul.f32 -48.020004, %v855_v2 }
 0x131   :  { %v1686_v9 = vpop.eup %1685  ;;  %1473 = vst.msk [vmem:[%s2803_s2 + $0x278] sm:$0xff] %vm1393_vm0, %v1684_v6  ;;  %v1311_v10 = vmul.f32 1.442695, %v1102_v4  ;;  %v979_v11 = vmul.f32 -48.020004, %v854_v5  ;;  %v585_v12 = vpop.permute.xlu1 %584 }
 0x132   :  { %1472 = vst.msk [vmem:[%s2803_s2 + $0x270] sm:$0xff] %vm1393_vm0, %v1686_v9  ;;  %1695 = vpow2.f32 %v1313_v7  ;;  %v1105_v13 = vmul.f32 %v980_v8, %v855_v2  ;;  %v857_v14 = vsub.f32 %v585_v12, %v2401_v58  ;;  %v580_v15 = vpop.permute.xlu0 %579 }
 0x133   :  { %1697 = vpow2.f32 %v1311_v10  ;;  %v1104_v16 = vmul.f32 %v979_v11, %v854_v5  ;;  %v856_v17 = vsub.f32 %v580_v15, %v2401_v58 }
 0x134   :  { %v1688_v18 = vpop.eup %1687  ;;  %v1317_v19 = vmul.f32 1.442695, %v1105_v13  ;;  %v982_v20 = vmul.f32 -48.020004, %v857_v14 }
 0x135   :  { %v1690_v21 = vpop.eup %1689  ;;  %1475 = vst.msk [vmem:[%s2803_s2 + $0x288] sm:$0xff] %vm1393_vm0, %v1688_v18  ;;  %v1315_v22 = vmul.f32 1.442695, %v1104_v16  ;;  %v981_v23 = vmul.f32 -48.020004, %v856_v17  ;;  %v595_v24 = vpop.permute.xlu1 %594 }
 0x136   :  { %1474 = vst.msk [vmem:[%s2803_s2 + $0x280] sm:$0xff] %vm1393_vm0, %v1690_v21  ;;  %1699 = vpow2.f32 %v1317_v19  ;;  %v1107_v25 = vmul.f32 %v982_v20, %v857_v14  ;;  %v859_v26 = vsub.f32 %v595_v24, %v2401_v58  ;;  %v590_v27 = vpop.permute.xlu0 %589 }
 0x137   :  { %1701 = vpow2.f32 %v1315_v22  ;;  %v1106_v28 = vmul.f32 %v981_v23, %v856_v17  ;;  %v858_v29 = vsub.f32 %v590_v27, %v2401_v58 }
 0x138   :  { %v1692_v30 = vpop.eup %1691  ;;  %v1321_v31 = vmul.f32 1.442695, %v1107_v25  ;;  %v984_v32 = vmul.f32 -48.020004, %v859_v26 }
 0x139   :  { %v1694_v33 = vpop.eup %1693  ;;  %1477 = vst.msk [vmem:[%s2803_s2 + $0x298] sm:$0xff] %vm1393_vm0, %v1692_v30  ;;  %v1319_v34 = vmul.f32 1.442695, %v1106_v28  ;;  %v983_v35 = vmul.f32 -48.020004, %v858_v29  ;;  %v605_v36 = vpop.permute.xlu1 %604 }
 0x13a   :  { %1476 = vst.msk [vmem:[%s2803_s2 + $0x290] sm:$0xff] %vm1393_vm0, %v1694_v33  ;;  %1703 = vpow2.f32 %v1321_v31  ;;  %v1109_v37 = vmul.f32 %v984_v32, %v859_v26  ;;  %v861_v38 = vsub.f32 %v605_v36, %v2401_v58  ;;  %v600_v39 = vpop.permute.xlu0 %599 }
 0x13b   :  { %1705 = vpow2.f32 %v1319_v34  ;;  %v1108_v40 = vmul.f32 %v983_v35, %v858_v29  ;;  %v860_v41 = vsub.f32 %v600_v39, %v2401_v58 }
 0x13c   :  { %v1696_v42 = vpop.eup %1695  ;;  %v1325_v43 = vmul.f32 1.442695, %v1109_v37  ;;  %v986_v44 = vmul.f32 -48.020004, %v861_v38 }
 0x13d   :  { %v1698_v45 = vpop.eup %1697  ;;  %1479 = vst.msk [vmem:[%s2803_s2 + $0x2a8] sm:$0xff] %vm1393_vm0, %v1696_v42  ;;  %v1323_v46 = vmul.f32 1.442695, %v1108_v40  ;;  %v985_v47 = vmul.f32 -48.020004, %v860_v41  ;;  %v615_v48 = vpop.permute.xlu1 %614 }
 0x13e   :  { %1478 = vst.msk [vmem:[%s2803_s2 + $0x2a0] sm:$0xff] %vm1393_vm0, %v1698_v45  ;;  %1707 = vpow2.f32 %v1325_v43  ;;  %v1111_v49 = vmul.f32 %v986_v44, %v861_v38  ;;  %v863_v50 = vsub.f32 %v615_v48, %v2401_v58  ;;  %v610_v51 = vpop.permute.xlu0 %609 }
 0x13f   :  { %1709 = vpow2.f32 %v1323_v46  ;;  %v1110_v52 = vmul.f32 %v985_v47, %v860_v41  ;;  %v862_v53 = vsub.f32 %v610_v51, %v2401_v58 }
 0x140   :  { %v1700_v1 = vpop.eup %1699  ;;  %v1329_v54 = vmul.f32 1.442695, %v1111_v49  ;;  %v988_v55 = vmul.f32 -48.020004, %v863_v50 }
 0x141   :  { %v1702_v56 = vpop.eup %1701  ;;  %1481 = vst.msk [vmem:[%s2803_s2 + $0x2b8] sm:$0xff] %vm1393_vm0, %v1700_v1  ;;  %v1327_v57 = vmul.f32 1.442695, %v1110_v52  ;;  %v987_v59 = vmul.f32 -48.020004, %v862_v53  ;;  %v625_v60 = vpop.permute.xlu1 %624 }
 0x142   :  { %1480 = vst.msk [vmem:[%s2803_s2 + $0x2b0] sm:$0xff] %vm1393_vm0, %v1702_v56  ;;  %1711 = vpow2.f32 %v1329_v54  ;;  %v1113_v61 = vmul.f32 %v988_v55, %v863_v50  ;;  %v865_v62 = vsub.f32 %v625_v60, %v2401_v58  ;;  %v620_v63 = vpop.permute.xlu0 %619 }
 0x143   :  { %1713 = vpow2.f32 %v1327_v57  ;;  %v1112_v0 = vmul.f32 %v987_v59, %v862_v53  ;;  %v864_v2 = vsub.f32 %v620_v63, %v2401_v58 }
 0x144   :  { %v1704_v3 = vpop.eup %1703  ;;  %v1333_v4 = vmul.f32 1.442695, %v1113_v61  ;;  %v990_v5 = vmul.f32 -48.020004, %v865_v62 }
 0x145   :  { %v1706_v6 = vpop.eup %1705  ;;  %1483 = vst.msk [vmem:[%s2803_s2 + $0x2c8] sm:$0xff] %vm1393_vm0, %v1704_v3  ;;  %v1331_v7 = vmul.f32 1.442695, %v1112_v0  ;;  %v989_v8 = vmul.f32 -48.020004, %v864_v2  ;;  %v635_v9 = vpop.permute.xlu1 %634 }
 0x146   :  { %1482 = vst.msk [vmem:[%s2803_s2 + $0x2c0] sm:$0xff] %vm1393_vm0, %v1706_v6  ;;  %1715 = vpow2.f32 %v1333_v4  ;;  %v1115_v10 = vmul.f32 %v990_v5, %v865_v62  ;;  %v867_v11 = vsub.f32 %v635_v9, %v2401_v58  ;;  %v630_v12 = vpop.permute.xlu0 %629 }
 0x147   :  { %1717 = vpow2.f32 %v1331_v7  ;;  %v1114_v13 = vmul.f32 %v989_v8, %v864_v2  ;;  %v866_v14 = vsub.f32 %v630_v12, %v2401_v58 }
 0x148   :  { %v1708_v15 = vpop.eup %1707  ;;  %v1337_v16 = vmul.f32 1.442695, %v1115_v10  ;;  %v992_v17 = vmul.f32 -48.020004, %v867_v11 }
 0x149   :  { %v1710_v18 = vpop.eup %1709  ;;  %1485 = vst.msk [vmem:[%s2803_s2 + $0x2d8] sm:$0xff] %vm1393_vm0, %v1708_v15  ;;  %v1335_v19 = vmul.f32 1.442695, %v1114_v13  ;;  %v991_v20 = vmul.f32 -48.020004, %v866_v14  ;;  %v645_v21 = vpop.permute.xlu1 %644 }
 0x14a   :  { %1484 = vst.msk [vmem:[%s2803_s2 + $0x2d0] sm:$0xff] %vm1393_vm0, %v1710_v18  ;;  %1719 = vpow2.f32 %v1337_v16  ;;  %v1117_v22 = vmul.f32 %v992_v17, %v867_v11  ;;  %v869_v23 = vsub.f32 %v645_v21, %v2401_v58  ;;  %v640_v24 = vpop.permute.xlu0 %639 }
 0x14b   :  { %1721 = vpow2.f32 %v1335_v19  ;;  %v1116_v25 = vmul.f32 %v991_v20, %v866_v14  ;;  %v868_v26 = vsub.f32 %v640_v24, %v2401_v58 }
 0x14c   :  { %v1712_v27 = vpop.eup %1711  ;;  %v1341_v28 = vmul.f32 1.442695, %v1117_v22  ;;  %v994_v29 = vmul.f32 -48.020004, %v869_v23 }
 0x14d   :  { %v1714_v30 = vpop.eup %1713  ;;  %1487 = vst.msk [vmem:[%s2803_s2 + $0x2e8] sm:$0xff] %vm1393_vm0, %v1712_v27  ;;  %v1339_v31 = vmul.f32 1.442695, %v1116_v25  ;;  %v993_v32 = vmul.f32 -48.020004, %v868_v26  ;;  %v655_v33 = vpop.permute.xlu1 %654 }
 0x14e   :  { %1486 = vst.msk [vmem:[%s2803_s2 + $0x2e0] sm:$0xff] %vm1393_vm0, %v1714_v30  ;;  %1723 = vpow2.f32 %v1341_v28  ;;  %v1119_v34 = vmul.f32 %v994_v29, %v869_v23  ;;  %v871_v35 = vsub.f32 %v655_v33, %v2401_v58  ;;  %v650_v36 = vpop.permute.xlu0 %649 }
 0x14f   :  { %1725 = vpow2.f32 %v1339_v31  ;;  %v1118_v37 = vmul.f32 %v993_v32, %v868_v26  ;;  %v870_v38 = vsub.f32 %v650_v36, %v2401_v58 }
 0x150   :  { %v1716_v39 = vpop.eup %1715  ;;  %v1345_v40 = vmul.f32 1.442695, %v1119_v34  ;;  %v996_v41 = vmul.f32 -48.020004, %v871_v35 }
 0x151   :  { %v1718_v42 = vpop.eup %1717  ;;  %1489 = vst.msk [vmem:[%s2803_s2 + $0x2f8] sm:$0xff] %vm1393_vm0, %v1716_v39  ;;  %v1343_v43 = vmul.f32 1.442695, %v1118_v37  ;;  %v995_v44 = vmul.f32 -48.020004, %v870_v38  ;;  %v665_v45 = vpop.permute.xlu1 %664 }
 0x152   :  { %1488 = vst.msk [vmem:[%s2803_s2 + $0x2f0] sm:$0xff] %vm1393_vm0, %v1718_v42  ;;  %1727 = vpow2.f32 %v1345_v40  ;;  %v1121_v46 = vmul.f32 %v996_v41, %v871_v35  ;;  %v873_v47 = vsub.f32 %v665_v45, %v2401_v58  ;;  %v660_v48 = vpop.permute.xlu0 %659 }
 0x153   :  { %1729 = vpow2.f32 %v1343_v43  ;;  %v1120_v49 = vmul.f32 %v995_v44, %v870_v38  ;;  %v872_v50 = vsub.f32 %v660_v48, %v2401_v58 }
 0x154   :  { %v1720_v51 = vpop.eup %1719  ;;  %v1349_v52 = vmul.f32 1.442695, %v1121_v46  ;;  %v998_v53 = vmul.f32 -48.020004, %v873_v47 }
 0x155   :  { %v1722_v1 = vpop.eup %1721  ;;  %1491 = vst.msk [vmem:[%s2803_s2 + $0x308] sm:$0xff] %vm1393_vm0, %v1720_v51  ;;  %v1347_v54 = vmul.f32 1.442695, %v1120_v49  ;;  %v997_v55 = vmul.f32 -48.020004, %v872_v50  ;;  %v675_v56 = vpop.permute.xlu1 %674 }
 0x156   :  { %1490 = vst.msk [vmem:[%s2803_s2 + $0x300] sm:$0xff] %vm1393_vm0, %v1722_v1  ;;  %1731 = vpow2.f32 %v1349_v52  ;;  %v1123_v57 = vmul.f32 %v998_v53, %v873_v47  ;;  %v875_v59 = vsub.f32 %v675_v56, %v2401_v58  ;;  %v670_v60 = vpop.permute.xlu0 %669 }
 0x157   :  { %1733 = vpow2.f32 %v1347_v54  ;;  %v1122_v61 = vmul.f32 %v997_v55, %v872_v50  ;;  %v874_v62 = vsub.f32 %v670_v60, %v2401_v58 }
 0x158   :  { %v1724_v63 = vpop.eup %1723  ;;  %v1353_v0 = vmul.f32 1.442695, %v1123_v57  ;;  %v1000_v2 = vmul.f32 -48.020004, %v875_v59 }
 0x159   :  { %v1726_v3 = vpop.eup %1725  ;;  %1493 = vst.msk [vmem:[%s2803_s2 + $0x318] sm:$0xff] %vm1393_vm0, %v1724_v63  ;;  %v1351_v4 = vmul.f32 1.442695, %v1122_v61  ;;  %v999_v5 = vmul.f32 -48.020004, %v874_v62  ;;  %v685_v6 = vpop.permute.xlu1 %684 }
 0x15a   :  { %1492 = vst.msk [vmem:[%s2803_s2 + $0x310] sm:$0xff] %vm1393_vm0, %v1726_v3  ;;  %1735 = vpow2.f32 %v1353_v0  ;;  %v1125_v7 = vmul.f32 %v1000_v2, %v875_v59  ;;  %v877_v8 = vsub.f32 %v685_v6, %v2401_v58  ;;  %v680_v9 = vpop.permute.xlu0 %679 }
 0x15b   :  { %1737 = vpow2.f32 %v1351_v4  ;;  %v1124_v10 = vmul.f32 %v999_v5, %v874_v62  ;;  %v876_v11 = vsub.f32 %v680_v9, %v2401_v58 }
 0x15c   :  { %v1728_v12 = vpop.eup %1727  ;;  %v1357_v13 = vmul.f32 1.442695, %v1125_v7  ;;  %v1002_v14 = vmul.f32 -48.020004, %v877_v8 }
 0x15d   :  { %v1730_v15 = vpop.eup %1729  ;;  %1495 = vst.msk [vmem:[%s2803_s2 + $0x328] sm:$0xff] %vm1393_vm0, %v1728_v12  ;;  %v1355_v16 = vmul.f32 1.442695, %v1124_v10  ;;  %v1001_v17 = vmul.f32 -48.020004, %v876_v11  ;;  %v695_v18 = vpop.permute.xlu1 %694 }
 0x15e   :  { %1494 = vst.msk [vmem:[%s2803_s2 + $0x320] sm:$0xff] %vm1393_vm0, %v1730_v15  ;;  %1739 = vpow2.f32 %v1357_v13  ;;  %v1127_v19 = vmul.f32 %v1002_v14, %v877_v8  ;;  %v879_v20 = vsub.f32 %v695_v18, %v2401_v58  ;;  %v690_v21 = vpop.permute.xlu0 %689 }
 0x15f   :  { %1741 = vpow2.f32 %v1355_v16  ;;  %v1126_v22 = vmul.f32 %v1001_v17, %v876_v11  ;;  %v878_v23 = vsub.f32 %v690_v21, %v2401_v58 }
 0x160   :  { %v1732_v24 = vpop.eup %1731  ;;  %v1361_v25 = vmul.f32 1.442695, %v1127_v19  ;;  %v1004_v26 = vmul.f32 -48.020004, %v879_v20 }
 0x161   :  { %v1734_v27 = vpop.eup %1733  ;;  %1497 = vst.msk [vmem:[%s2803_s2 + $0x338] sm:$0xff] %vm1393_vm0, %v1732_v24  ;;  %v1359_v28 = vmul.f32 1.442695, %v1126_v22  ;;  %v1003_v29 = vmul.f32 -48.020004, %v878_v23  ;;  %v705_v30 = vpop.permute.xlu1 %704 }
 0x162   :  { %1496 = vst.msk [vmem:[%s2803_s2 + $0x330] sm:$0xff] %vm1393_vm0, %v1734_v27  ;;  %1743 = vpow2.f32 %v1361_v25  ;;  %v1129_v31 = vmul.f32 %v1004_v26, %v879_v20  ;;  %v881_v32 = vsub.f32 %v705_v30, %v2401_v58  ;;  %v700_v33 = vpop.permute.xlu0 %699 }
 0x163   :  { %1745 = vpow2.f32 %v1359_v28  ;;  %v1128_v34 = vmul.f32 %v1003_v29, %v878_v23  ;;  %v880_v35 = vsub.f32 %v700_v33, %v2401_v58 }
 0x164   :  { %v1736_v36 = vpop.eup %1735  ;;  %v1365_v37 = vmul.f32 1.442695, %v1129_v31  ;;  %v1006_v38 = vmul.f32 -48.020004, %v881_v32 }
 0x165   :  { %v1738_v39 = vpop.eup %1737  ;;  %1499 = vst.msk [vmem:[%s2803_s2 + $0x348] sm:$0xff] %vm1393_vm0, %v1736_v36  ;;  %v1363_v40 = vmul.f32 1.442695, %v1128_v34  ;;  %v1005_v41 = vmul.f32 -48.020004, %v880_v35  ;;  %v715_v42 = vpop.permute.xlu1 %714 }
 0x166   :  { %1498 = vst.msk [vmem:[%s2803_s2 + $0x340] sm:$0xff] %vm1393_vm0, %v1738_v39  ;;  %1747 = vpow2.f32 %v1365_v37  ;;  %v1131_v43 = vmul.f32 %v1006_v38, %v881_v32  ;;  %v883_v44 = vsub.f32 %v715_v42, %v2401_v58  ;;  %v710_v45 = vpop.permute.xlu0 %709 }
 0x167   :  { %1749 = vpow2.f32 %v1363_v40  ;;  %v1130_v46 = vmul.f32 %v1005_v41, %v880_v35  ;;  %v882_v47 = vsub.f32 %v710_v45, %v2401_v58 }
 0x168   :  { %v1740_v48 = vpop.eup %1739  ;;  %v1369_v49 = vmul.f32 1.442695, %v1131_v43  ;;  %v1008_v50 = vmul.f32 -48.020004, %v883_v44 }
 0x169   :  { %v1742_v51 = vpop.eup %1741  ;;  %1501 = vst.msk [vmem:[%s2803_s2 + $0x358] sm:$0xff] %vm1393_vm0, %v1740_v48  ;;  %v1367_v52 = vmul.f32 1.442695, %v1130_v46  ;;  %v1007_v53 = vmul.f32 -48.020004, %v882_v47  ;;  %v725_v1 = vpop.permute.xlu1 %724 }
 0x16a   :  { %1500 = vst.msk [vmem:[%s2803_s2 + $0x350] sm:$0xff] %vm1393_vm0, %v1742_v51  ;;  %1751 = vpow2.f32 %v1369_v49  ;;  %v1133_v54 = vmul.f32 %v1008_v50, %v883_v44  ;;  %v885_v55 = vsub.f32 %v725_v1, %v2401_v58  ;;  %v720_v56 = vpop.permute.xlu0 %719 }
 0x16b   :  { %1753 = vpow2.f32 %v1367_v52  ;;  %v1132_v57 = vmul.f32 %v1007_v53, %v882_v47  ;;  %v884_v59 = vsub.f32 %v720_v56, %v2401_v58  ;;  %v1778_v58 = vld [vmem:[%s2802_s1] ss:$0 sm:$0xff] }
 0x16c   :  { %v1744_v60 = vpop.eup %1743  ;;  %v1373_v61 = vmul.f32 1.442695, %v1133_v54  ;;  %v1010_v62 = vmul.f32 -48.020004, %v885_v55 }
 0x16d   :  { %v1746_v63 = vpop.eup %1745  ;;  %1503 = vst.msk [vmem:[%s2803_s2 + $0x368] sm:$0xff] %vm1393_vm0, %v1744_v60  ;;  %v1371_v0 = vmul.f32 1.442695, %v1132_v57  ;;  %v1009_v2 = vmul.f32 -48.020004, %v884_v59  ;;  %v735_v3 = vpop.permute.xlu1 %734 }
 0x16e   :  { %1502 = vst.msk [vmem:[%s2803_s2 + $0x360] sm:$0xff] %vm1393_vm0, %v1746_v63  ;;  %1755 = vpow2.f32 %v1373_v61  ;;  %v1135_v4 = vmul.f32 %v1010_v62, %v885_v55  ;;  %v887_v5 = vsub.f32 %v735_v3, %v1778_v58  ;;  %v730_v6 = vpop.permute.xlu0 %729 }
 0x16f   :  { %1757 = vpow2.f32 %v1371_v0  ;;  %v1134_v7 = vmul.f32 %v1009_v2, %v884_v59  ;;  %v886_v8 = vsub.f32 %v730_v6, %v1778_v58 }
 0x170   :  { %v1748_v9 = vpop.eup %1747  ;;  %v1377_v10 = vmul.f32 1.442695, %v1135_v4  ;;  %v1012_v11 = vmul.f32 -48.020004, %v887_v5 }
 0x171   :  { %v1750_v12 = vpop.eup %1749  ;;  %1505 = vst.msk [vmem:[%s2803_s2 + $0x378] sm:$0xff] %vm1393_vm0, %v1748_v9  ;;  %v1375_v13 = vmul.f32 1.442695, %v1134_v7  ;;  %v1011_v14 = vmul.f32 -48.020004, %v886_v8  ;;  %v745_v15 = vpop.permute.xlu1 %744 }
 0x172   :  { %1504 = vst.msk [vmem:[%s2803_s2 + $0x370] sm:$0xff] %vm1393_vm0, %v1750_v12  ;;  %1759 = vpow2.f32 %v1377_v10  ;;  %v1137_v16 = vmul.f32 %v1012_v11, %v887_v5  ;;  %v889_v17 = vsub.f32 %v745_v15, %v1778_v58  ;;  %v740_v18 = vpop.permute.xlu0 %739 }
 0x173   :  { %1761 = vpow2.f32 %v1375_v13  ;;  %v1136_v19 = vmul.f32 %v1011_v14, %v886_v8  ;;  %v888_v20 = vsub.f32 %v740_v18, %v1778_v58 }
 0x174   :  { %v1752_v21 = vpop.eup %1751  ;;  %v1381_v22 = vmul.f32 1.442695, %v1137_v16  ;;  %v1014_v23 = vmul.f32 -48.020004, %v889_v17 }
 0x175   :  { %v1754_v24 = vpop.eup %1753  ;;  %1507 = vst.msk [vmem:[%s2803_s2 + $0x388] sm:$0xff] %vm1393_vm0, %v1752_v21  ;;  %v1379_v25 = vmul.f32 1.442695, %v1136_v19  ;;  %v1013_v26 = vmul.f32 -48.020004, %v888_v20  ;;  %v755_v27 = vpop.permute.xlu1 %754 }
 0x176   :  { %1506 = vst.msk [vmem:[%s2803_s2 + $0x380] sm:$0xff] %vm1393_vm0, %v1754_v24  ;;  %1763 = vpow2.f32 %v1381_v22  ;;  %v1139_v28 = vmul.f32 %v1014_v23, %v889_v17  ;;  %v891_v29 = vsub.f32 %v755_v27, %v1778_v58  ;;  %v750_v30 = vpop.permute.xlu0 %749 }
 0x177   :  { %1765 = vpow2.f32 %v1379_v25  ;;  %v1138_v31 = vmul.f32 %v1013_v26, %v888_v20  ;;  %v890_v32 = vsub.f32 %v750_v30, %v1778_v58 }
 0x178   :  { %v1756_v33 = vpop.eup %1755  ;;  %v1385_v34 = vmul.f32 1.442695, %v1139_v28  ;;  %v1016_v35 = vmul.f32 -48.020004, %v891_v29 }
 0x179   :  { %v1758_v36 = vpop.eup %1757  ;;  %1509 = vst.msk [vmem:[%s2803_s2 + $0x398] sm:$0xff] %vm1393_vm0, %v1756_v33  ;;  %v1383_v37 = vmul.f32 1.442695, %v1138_v31  ;;  %v1015_v38 = vmul.f32 -48.020004, %v890_v32 }
 0x17a   :  { %1508 = vst.msk [vmem:[%s2803_s2 + $0x390] sm:$0xff] %vm1393_vm0, %v1758_v36  ;;  %1767 = vpow2.f32 %v1385_v34  ;;  %v1141_v39 = vmul.f32 %v1016_v35, %v891_v29  ;;  %v760_v40 = vpop.permute.xlu0 %759 }
 0x17b   :  { %1769 = vpow2.f32 %v1383_v37  ;;  %v1140_v41 = vmul.f32 %v1015_v38, %v890_v32  ;;  %v892_v42 = vsub.f32 %v760_v40, %v1778_v58 }
 0x17c   :  { %v1760_v43 = vpop.eup %1759  ;;  %v1389_v44 = vmul.f32 1.442695, %v1141_v39 }
 0x17d   :  { %v1762_v45 = vpop.eup %1761  ;;  %1511 = vst.msk [vmem:[%s2803_s2 + $0x3a8] sm:$0xff] %vm1393_vm0, %v1760_v43  ;;  %v1387_v46 = vmul.f32 1.442695, %v1140_v41  ;;  %v1017_v47 = vmul.f32 -48.020004, %v892_v42 }
 0x17e   :  { %1510 = vst.msk [vmem:[%s2803_s2 + $0x3a0] sm:$0xff] %vm1393_vm0, %v1762_v45  ;;  %1771 = vpow2.f32 %v1389_v44 }
 0x17f   :  { %1773 = vpow2.f32 %v1387_v46  ;;  %v1142_v48 = vmul.f32 %v1017_v47, %v892_v42 }
 0x180   :  { %v1764_v49 = vpop.eup %1763 }
 0x181   :  { %v1766_v50 = vpop.eup %1765  ;;  %1513 = vst.msk [vmem:[%s2803_s2 + $0x3b8] sm:$0xff] %vm1393_vm0, %v1764_v49  ;;  %v1391_v51 = vmul.f32 1.442695, %v1142_v48 }
 0x182   :  { %1512 = vst.msk [vmem:[%s2803_s2 + $0x3b0] sm:$0xff] %vm1393_vm0, %v1766_v50 }
 0x183   :  { %1775 = vpow2.f32 %v1391_v51 }
 0x184   :  { %v1768_v52 = vpop.eup %1767 }
 0x185   :  { %v1770_v53 = vpop.eup %1769  ;;  %1515 = vst.msk [vmem:[%s2803_s2 + $0x3c8] sm:$0xff] %vm1393_vm0, %v1768_v52 }
 0x186   :  { %1514 = vst.msk [vmem:[%s2803_s2 + $0x3c0] sm:$0xff] %vm1393_vm0, %v1770_v53 }
 0x188   :  { %v1772_v1 = vpop.eup %1771 }
 0x189   :  { %v1774_v54 = vpop.eup %1773  ;;  %1517 = vst.msk [vmem:[%s2803_s2 + $0x3d8] sm:$0xff] %vm1393_vm0, %v1772_v1 }
 0x18a   :  { %1516 = vst.msk [vmem:[%s2803_s2 + $0x3d0] sm:$0xff] %vm1393_vm0, %v1774_v54 }
 0x18d   :  { %v1776_v55 = vpop.eup %1775 }
 0x18e   :  { %1518 = vst.msk [vmem:[%s2803_s2 + $0x3e0] sm:$0xff] %vm1393_vm0, %v1776_v55 }

</bundles_post_ra>
